<compile_context>
chip_gen: v7x
topology: tpu7x:2x2x1
jax: 0.10.0
libtpu: 0.0.40
codegen_flags: <defaults>
</compile_context>

<pallas_src>
import jax
import jax.numpy as jnp
from jax.experimental import pallas as pl
from jax.experimental.pallas import tpu as pltpu

NUM_CHARS = 256


# ----------------------------------------------------------------------------
# Layer specs matching the PyTorch module
# ----------------------------------------------------------------------------
def conv_layer_specs(emb_dim, hidden_dim, cnn_depth):
    assert cnn_depth >= 5
    specs = [
        (emb_dim, hidden_dim, 7, 1, 3),     # Conv1d(emb, H, 7, padding=3)
        (hidden_dim, hidden_dim, 3, 2, 1),  # Conv1d(H, H, stride=2)
        (hidden_dim, hidden_dim, 7, 1, 3),  # Conv1d(H, H, 7, padding=3)
        (hidden_dim, hidden_dim, 3, 2, 1),  # Conv1d(H, H, stride=2)
    ]
    specs += [(hidden_dim, hidden_dim, 3, 1, 1)] * (cnn_depth - 5)
    specs += [(hidden_dim, hidden_dim, 3, 2, 1)]  # Conv1d(H, H, stride=2)
    return specs


# ----------------------------------------------------------------------------
# In-kernel conv: per-tap accumulation, channels-last, fully VMEM-resident
# ----------------------------------------------------------------------------
def _conv1d_relu(x, w_ref, b_ref, k, stride, pad):
    """x: (L_in, Cin) f32 value; w_ref: (k, Cin, Cout) bf16; b_ref: (1, Cout) f32."""
    L_in = x.shape[0]
    cout = w_ref.shape[-1]
    L_out = (L_in + 2 * pad - k) // stride + 1
    rows = jax.lax.broadcasted_iota(jnp.int32, (L_out, L_in), 0)
    cols = jax.lax.broadcasted_iota(jnp.int32, (L_out, L_in), 1)
    x_bf = x.astype(jnp.bfloat16)
    acc = jnp.zeros((L_out, cout), jnp.float32)
    for t in range(k):
        # Output row j reads padded input position stride*j + t - pad.  Out-of-range
        # positions match no column -> a zero row -> implicit zero padding (PyTorch semantics).
        sel = (cols == stride * rows + (t - pad)).astype(jnp.float32).astype(jnp.bfloat16)
        xt = jnp.dot(sel, x_bf, preferred_element_type=jnp.float32)            # (L_out, Cin)
        acc = acc + jnp.dot(xt.astype(jnp.bfloat16), w_ref[t],
                            preferred_element_type=jnp.float32)                # (L_out, Cout)
    return jnp.maximum(acc + b_ref[...], 0.0)


def _make_txtcnn_kernel(L, conv_meta, L8):
    nconv = len(conv_meta)

    def kernel(*refs):
        ids_ref, emb_ref = refs[0], refs[1]
        fcw_ref = refs[2 + 2 * nconv]
        fcb_ref = refs[3 + 2 * nconv]
        out_ref = refs[4 + 2 * nconv]

        # ---- embedding: one-hot(ids) @ table on the MXU (K = 256 contraction) ----
        ids = ids_ref[0]                                                # (L, 1) int32
        iota_v = jax.lax.broadcasted_iota(jnp.int32, (L, NUM_CHARS), 1)
        onehot = (iota_v == ids).astype(jnp.float32).astype(jnp.bfloat16)
        x = jnp.dot(onehot, emb_ref[...], preferred_element_type=jnp.float32)  # (L, E) f32

        # ---- conv stack (channels-last), never leaves VMEM ----
        for li, (k, stride, pad) in enumerate(conv_meta):
            w_ref = refs[2 + 2 * li]
            b_ref = refs[3 + 2 * li]
            x = _conv1d_relu(x, w_ref, b_ref, k, stride, pad)           # (L', H)

        # ---- FC: weight rows permuted at init, so no activation transpose needed ----
        y = jnp.zeros((1, fcw_ref.shape[-1]), jnp.float32)
        for l in range(L8):
            y = y + jnp.dot(x[l:l + 1, :].astype(jnp.bfloat16), fcw_ref[l],
                            preferred_element_type=jnp.float32)
        out_ref[0] = jnp.maximum(y + fcb_ref[...], 0.0)

    return kernel


# ----------------------------------------------------------------------------
# Parameter construction (deterministic, synthetic)
# ----------------------------------------------------------------------------
def init_params(key, emb_dim, hidden_dim, cnn_depth, input_len):
    assert cnn_depth >= 5
    assert input_len >= 8
    specs = conv_layer_specs(emb_dim, hidden_dim, cnn_depth)
    keys = jax.random.split(key, 1 + 2 * len(specs) + 2)
    ki = iter(keys)

    params = {}
    params["emb"] = (0.1 * jax.random.normal(next(ki), (NUM_CHARS, emb_dim),
                                             jnp.float32)).astype(jnp.bfloat16)

    convs = []
    for (cin, cout, k, stride, pad) in specs:
        fan_in = k * cin
        # layout (k, Cin, Cout); real PyTorch weights (Cout, Cin, k) need .permute(2,1,0)
        w = (jax.random.normal(next(ki), (k, cin, cout), jnp.float32)
             / jnp.sqrt(fan_in)).astype(jnp.bfloat16)
        b = 0.01 * jax.random.normal(next(ki), (1, cout), jnp.float32)
        convs.append((w, b, k, stride, pad))
    params["convs"] = convs

    L8 = input_len // 8
    fc_in = L8 * hidden_dim
    fc_w = jax.random.normal(next(ki), (fc_in, hidden_dim), jnp.float32) / jnp.sqrt(fc_in)
    # torch's flatten(1) on (B, C=H, L=L8) orders rows as c*L8 + l; permute once at init
    # to (L8, H, H) so the kernel consumes the channels-last activation directly.
    fc_w = fc_w.reshape(hidden_dim, L8, hidden_dim).transpose(1, 0, 2)
    params["fc_w"] = fc_w.astype(jnp.bfloat16)                      # (L8, H, H)
    params["fc_b"] = 0.01 * jax.random.normal(next(ki), (1, hidden_dim), jnp.float32)
    return params


# ----------------------------------------------------------------------------
# Forward:  (B, L) int tokens -> (B, H)   — one fused pallas_call
# ----------------------------------------------------------------------------
def txt_cnn_forward(params, ids):
    B, L = ids.shape
    emb = params["emb"]
    convs = params["convs"]
    fc_w, fc_b = params["fc_w"], params["fc_b"]
    H = fc_b.shape[-1]
    L8 = L // 8
    conv_meta = [(k, s, p) for (_, _, k, s, p) in convs]

    kernel = _make_txtcnn_kernel(L, conv_meta, L8)

    def whole(arr):  # resident (whole-array) block, same block index every grid step
        n = arr.ndim
        return pl.BlockSpec(arr.shape, lambda b, _n=n: (0,) * _n)

    ids3 = ids.astype(jnp.int32).reshape(B, L, 1)
    in_specs = [pl.BlockSpec((1, L, 1), lambda b: (b, 0, 0)), whole(emb)]
    inputs = [ids3, emb]
    for (w, bias, _k, _s, _p) in convs:
        in_specs += [whole(w), whole(bias)]
        inputs += [w, bias]
    in_specs += [whole(fc_w), whole(fc_b)]
    inputs += [fc_w, fc_b]

    out = pl.pallas_call(
        kernel,
        out_shape=jax.ShapeDtypeStruct((B, 1, H), jnp.float32),
        grid=(B,),
        in_specs=in_specs,
        out_specs=pl.BlockSpec((1, 1, H), lambda b: (b, 0, 0)),
        compiler_params=pltpu.CompilerParams(
            dimension_semantics=("parallel",),      # shard batch across v7x's 2 TCs
            vmem_limit_bytes=32 * 1024 * 1024,      # explicit; safe on v5e/v6e/v7x
        ),
    )(*inputs)
    return out.reshape(B, H)


if __name__ == "__main__":
    B, L = 2, 16
    emb_dim, hidden_dim, cnn_depth = 16, 32, 5

    key = jax.random.PRNGKey(0)
    k_params, k_ids = jax.random.split(key)
    params = init_params(k_params, emb_dim, hidden_dim, cnn_depth, L)
    ids = jax.random.randint(k_ids, (B, L), 0, NUM_CHARS, dtype=jnp.int32)

    out = txt_cnn_forward(params, ids)
    out = jax.block_until_ready(out)
    assert out.shape == (B, hidden_dim), out.shape
    assert bool(jnp.all(jnp.isfinite(out)))
    print("KERNEL_OK")
</pallas_src>

<mosaic_0001>
module attributes {stable_mosaic.version = 11 : i64} {
  func.func @kernel(%arg0: i32, %arg1: memref<1x16x1xi32, #tpu.memory_space<vmem>>, %arg2: memref<256x16xbf16, #tpu.memory_space<vmem>>, %arg3: memref<7x16x32xbf16, #tpu.memory_space<vmem>>, %arg4: memref<1x32xf32, #tpu.memory_space<vmem>>, %arg5: memref<3x32x32xbf16, #tpu.memory_space<vmem>>, %arg6: memref<1x32xf32, #tpu.memory_space<vmem>>, %arg7: memref<7x32x32xbf16, #tpu.memory_space<vmem>>, %arg8: memref<1x32xf32, #tpu.memory_space<vmem>>, %arg9: memref<3x32x32xbf16, #tpu.memory_space<vmem>>, %arg10: memref<1x32xf32, #tpu.memory_space<vmem>>, %arg11: memref<3x32x32xbf16, #tpu.memory_space<vmem>>, %arg12: memref<1x32xf32, #tpu.memory_space<vmem>>, %arg13: memref<2x32x32xbf16, #tpu.memory_space<vmem>>, %arg14: memref<1x32xf32, #tpu.memory_space<vmem>>, %arg15: memref<1x1x32xf32, #tpu.memory_space<vmem>>) attributes {dimension_semantics = [#tpu.dimension_semantics<parallel>], iteration_bounds = array<i64: 2>, scalar_prefetch = 0 : i64, scratch_operands = 0 : i64, tpu.core_type = #tpu.core_type<tc>, window_params = [{transform_indices = @transform_0, window_bounds = array<i64: 1, 16, 1>}, {pipeline_mode = #tpu.pipeline_mode<synchronous>, transform_indices = @transform_1, window_bounds = array<i64: 256, 16>}, {pipeline_mode = #tpu.pipeline_mode<synchronous>, transform_indices = @transform_2, window_bounds = array<i64: 7, 16, 32>}, {pipeline_mode = #tpu.pipeline_mode<synchronous>, transform_indices = @transform_3, window_bounds = array<i64: 1, 32>}, {pipeline_mode = #tpu.pipeline_mode<synchronous>, transform_indices = @transform_4, window_bounds = array<i64: 3, 32, 32>}, {pipeline_mode = #tpu.pipeline_mode<synchronous>, transform_indices = @transform_5, window_bounds = array<i64: 1, 32>}, {pipeline_mode = #tpu.pipeline_mode<synchronous>, transform_indices = @transform_6, window_bounds = array<i64: 7, 32, 32>}, {pipeline_mode = #tpu.pipeline_mode<synchronous>, transform_indices = @transform_7, window_bounds = array<i64: 1, 32>}, {pipeline_mode = #tpu.pipeline_mode<synchronous>, transform_indices = @transform_8, window_bounds = array<i64: 3, 32, 32>}, {pipeline_mode = #tpu.pipeline_mode<synchronous>, transform_indices = @transform_9, window_bounds = array<i64: 1, 32>}, {pipeline_mode = #tpu.pipeline_mode<synchronous>, transform_indices = @transform_10, window_bounds = array<i64: 3, 32, 32>}, {pipeline_mode = #tpu.pipeline_mode<synchronous>, transform_indices = @transform_11, window_bounds = array<i64: 1, 32>}, {pipeline_mode = #tpu.pipeline_mode<synchronous>, transform_indices = @transform_12, window_bounds = array<i64: 2, 32, 32>}, {pipeline_mode = #tpu.pipeline_mode<synchronous>, transform_indices = @transform_13, window_bounds = array<i64: 1, 32>}, {transform_indices = @transform_14, window_bounds = array<i64: 1, 1, 32>}]} {
    %c0 = arith.constant 0 : index
    %c0_0 = arith.constant 0 : index
    %c0_1 = arith.constant 0 : index
    %0 = vector.load %arg1[%c0, %c0_0, %c0_1] : memref<1x16x1xi32, #tpu.memory_space<vmem>>, vector<1x16x1xi32>
    %1 = vector.shape_cast %0 : vector<1x16x1xi32> to vector<16x1xi32>
    %2 = tpu.iota {dimensions = array<i32: 1>} : vector<16x256xi32>
    %3 = vector.broadcast %1 : vector<16x1xi32> to vector<16x256xi32>
    %4 = arith.cmpi eq, %2, %3 : vector<16x256xi32>
    %5 = arith.extui %4 : vector<16x256xi1> to vector<16x256xi32>
    %6 = arith.sitofp %5 : vector<16x256xi32> to vector<16x256xf32>
    %7 = arith.truncf %6 : vector<16x256xf32> to vector<16x256xbf16>
    %c0_2 = arith.constant 0 : index
    %c0_3 = arith.constant 0 : index
    %8 = vector.load %arg2[%c0_2, %c0_3] : memref<256x16xbf16, #tpu.memory_space<vmem>>, vector<256x16xbf16>
    %cst = arith.constant dense<0.000000e+00> : vector<16x16xf32>
    %9 = tpu.matmul %7, %8, %cst {dimension_numbers = #tpu.dot_dimension_numbers<[1], [0], [0], [1], [0, 0, 1, 1], [], []>} : vector<16x256xbf16>, vector<256x16xbf16>, vector<16x16xf32> -> vector<16x16xf32>
    %10 = tpu.iota {dimensions = array<i32: 0>} : vector<16x16xi32>
    %11 = tpu.iota {dimensions = array<i32: 1>} : vector<16x16xi32>
    %12 = arith.truncf %9 : vector<16x16xf32> to vector<16x16xbf16>
    %cst_4 = arith.constant 0.000000e+00 : f32
    %13 = vector.broadcast %cst_4 : f32 to vector<16x32xf32>
    %c1_i32 = arith.constant 1 : i32
    %14 = vector.broadcast %c1_i32 : i32 to vector<16x16xi32>
    %15 = arith.muli %14, %10 : vector<16x16xi32>
    %c-3_i32 = arith.constant -3 : i32
    %16 = vector.broadcast %c-3_i32 : i32 to vector<16x16xi32>
    %17 = arith.addi %15, %16 : vector<16x16xi32>
    %18 = arith.cmpi eq, %11, %17 : vector<16x16xi32>
    %19 = arith.extui %18 : vector<16x16xi1> to vector<16x16xi32>
    %20 = arith.sitofp %19 : vector<16x16xi32> to vector<16x16xf32>
    %21 = arith.truncf %20 : vector<16x16xf32> to vector<16x16xbf16>
    %cst_5 = arith.constant dense<0.000000e+00> : vector<16x16xf32>
    %22 = tpu.matmul %21, %12, %cst_5 {dimension_numbers = #tpu.dot_dimension_numbers<[1], [0], [0], [1], [0, 0, 1, 1], [], []>} : vector<16x16xbf16>, vector<16x16xbf16>, vector<16x16xf32> -> vector<16x16xf32>
    %23 = arith.truncf %22 : vector<16x16xf32> to vector<16x16xbf16>
    %c0_6 = arith.constant 0 : index
    %c0_7 = arith.constant 0 : index
    %c0_8 = arith.constant 0 : index
    %24 = vector.load %arg3[%c0_6, %c0_7, %c0_8] : memref<7x16x32xbf16, #tpu.memory_space<vmem>>, vector<1x16x32xbf16>
    %25 = vector.shape_cast %24 : vector<1x16x32xbf16> to vector<16x32xbf16>
    %cst_9 = arith.constant dense<0.000000e+00> : vector<16x32xf32>
    %26 = tpu.matmul %23, %25, %cst_9 {dimension_numbers = #tpu.dot_dimension_numbers<[1], [0], [0], [1], [0, 0, 1, 1], [], []>} : vector<16x16xbf16>, vector<16x32xbf16>, vector<16x32xf32> -> vector<16x32xf32>
    %27 = arith.addf %13, %26 : vector<16x32xf32>
    %c1_i32_10 = arith.constant 1 : i32
    %28 = vector.broadcast %c1_i32_10 : i32 to vector<16x16xi32>
    %29 = arith.muli %28, %10 : vector<16x16xi32>
    %c-2_i32 = arith.constant -2 : i32
    %30 = vector.broadcast %c-2_i32 : i32 to vector<16x16xi32>
    %31 = arith.addi %29, %30 : vector<16x16xi32>
    %32 = arith.cmpi eq, %11, %31 : vector<16x16xi32>
    %33 = arith.extui %32 : vector<16x16xi1> to vector<16x16xi32>
    %34 = arith.sitofp %33 : vector<16x16xi32> to vector<16x16xf32>
    %35 = arith.truncf %34 : vector<16x16xf32> to vector<16x16xbf16>
    %cst_11 = arith.constant dense<0.000000e+00> : vector<16x16xf32>
    %36 = tpu.matmul %35, %12, %cst_11 {dimension_numbers = #tpu.dot_dimension_numbers<[1], [0], [0], [1], [0, 0, 1, 1], [], []>} : vector<16x16xbf16>, vector<16x16xbf16>, vector<16x16xf32> -> vector<16x16xf32>
    %37 = arith.truncf %36 : vector<16x16xf32> to vector<16x16xbf16>
    %c1 = arith.constant 1 : index
    %c0_12 = arith.constant 0 : index
    %c0_13 = arith.constant 0 : index
    %38 = vector.load %arg3[%c1, %c0_12, %c0_13] : memref<7x16x32xbf16, #tpu.memory_space<vmem>>, vector<1x16x32xbf16>
    %39 = vector.shape_cast %38 : vector<1x16x32xbf16> to vector<16x32xbf16>
    %cst_14 = arith.constant dense<0.000000e+00> : vector<16x32xf32>
    %40 = tpu.matmul %37, %39, %cst_14 {dimension_numbers = #tpu.dot_dimension_numbers<[1], [0], [0], [1], [0, 0, 1, 1], [], []>} : vector<16x16xbf16>, vector<16x32xbf16>, vector<16x32xf32> -> vector<16x32xf32>
    %41 = arith.addf %27, %40 : vector<16x32xf32>
    %c1_i32_15 = arith.constant 1 : i32
    %42 = vector.broadcast %c1_i32_15 : i32 to vector<16x16xi32>
    %43 = arith.muli %42, %10 : vector<16x16xi32>
    %c-1_i32 = arith.constant -1 : i32
    %44 = vector.broadcast %c-1_i32 : i32 to vector<16x16xi32>
    %45 = arith.addi %43, %44 : vector<16x16xi32>
    %46 = arith.cmpi eq, %11, %45 : vector<16x16xi32>
    %47 = arith.extui %46 : vector<16x16xi1> to vector<16x16xi32>
    %48 = arith.sitofp %47 : vector<16x16xi32> to vector<16x16xf32>
    %49 = arith.truncf %48 : vector<16x16xf32> to vector<16x16xbf16>
    %cst_16 = arith.constant dense<0.000000e+00> : vector<16x16xf32>
    %50 = tpu.matmul %49, %12, %cst_16 {dimension_numbers = #tpu.dot_dimension_numbers<[1], [0], [0], [1], [0, 0, 1, 1], [], []>} : vector<16x16xbf16>, vector<16x16xbf16>, vector<16x16xf32> -> vector<16x16xf32>
    %51 = arith.truncf %50 : vector<16x16xf32> to vector<16x16xbf16>
    %c2 = arith.constant 2 : index
    %c0_17 = arith.constant 0 : index
    %c0_18 = arith.constant 0 : index
    %52 = vector.load %arg3[%c2, %c0_17, %c0_18] : memref<7x16x32xbf16, #tpu.memory_space<vmem>>, vector<1x16x32xbf16>
    %53 = vector.shape_cast %52 : vector<1x16x32xbf16> to vector<16x32xbf16>
    %cst_19 = arith.constant dense<0.000000e+00> : vector<16x32xf32>
    %54 = tpu.matmul %51, %53, %cst_19 {dimension_numbers = #tpu.dot_dimension_numbers<[1], [0], [0], [1], [0, 0, 1, 1], [], []>} : vector<16x16xbf16>, vector<16x32xbf16>, vector<16x32xf32> -> vector<16x32xf32>
    %55 = arith.addf %41, %54 : vector<16x32xf32>
    %c1_i32_20 = arith.constant 1 : i32
    %56 = vector.broadcast %c1_i32_20 : i32 to vector<16x16xi32>
    %57 = arith.muli %56, %10 : vector<16x16xi32>
    %c0_i32 = arith.constant 0 : i32
    %58 = vector.broadcast %c0_i32 : i32 to vector<16x16xi32>
    %59 = arith.addi %57, %58 : vector<16x16xi32>
    %60 = arith.cmpi eq, %11, %59 : vector<16x16xi32>
    %61 = arith.extui %60 : vector<16x16xi1> to vector<16x16xi32>
    %62 = arith.sitofp %61 : vector<16x16xi32> to vector<16x16xf32>
    %63 = arith.truncf %62 : vector<16x16xf32> to vector<16x16xbf16>
    %cst_21 = arith.constant dense<0.000000e+00> : vector<16x16xf32>
    %64 = tpu.matmul %63, %12, %cst_21 {dimension_numbers = #tpu.dot_dimension_numbers<[1], [0], [0], [1], [0, 0, 1, 1], [], []>} : vector<16x16xbf16>, vector<16x16xbf16>, vector<16x16xf32> -> vector<16x16xf32>
    %65 = arith.truncf %64 : vector<16x16xf32> to vector<16x16xbf16>
    %c3 = arith.constant 3 : index
    %c0_22 = arith.constant 0 : index
    %c0_23 = arith.constant 0 : index
    %66 = vector.load %arg3[%c3, %c0_22, %c0_23] : memref<7x16x32xbf16, #tpu.memory_space<vmem>>, vector<1x16x32xbf16>
    %67 = vector.shape_cast %66 : vector<1x16x32xbf16> to vector<16x32xbf16>
    %cst_24 = arith.constant dense<0.000000e+00> : vector<16x32xf32>
    %68 = tpu.matmul %65, %67, %cst_24 {dimension_numbers = #tpu.dot_dimension_numbers<[1], [0], [0], [1], [0, 0, 1, 1], [], []>} : vector<16x16xbf16>, vector<16x32xbf16>, vector<16x32xf32> -> vector<16x32xf32>
    %69 = arith.addf %55, %68 : vector<16x32xf32>
    %c1_i32_25 = arith.constant 1 : i32
    %70 = vector.broadcast %c1_i32_25 : i32 to vector<16x16xi32>
    %71 = arith.muli %70, %10 : vector<16x16xi32>
    %c1_i32_26 = arith.constant 1 : i32
    %72 = vector.broadcast %c1_i32_26 : i32 to vector<16x16xi32>
    %73 = arith.addi %71, %72 : vector<16x16xi32>
    %74 = arith.cmpi eq, %11, %73 : vector<16x16xi32>
    %75 = arith.extui %74 : vector<16x16xi1> to vector<16x16xi32>
    %76 = arith.sitofp %75 : vector<16x16xi32> to vector<16x16xf32>
    %77 = arith.truncf %76 : vector<16x16xf32> to vector<16x16xbf16>
    %cst_27 = arith.constant dense<0.000000e+00> : vector<16x16xf32>
    %78 = tpu.matmul %77, %12, %cst_27 {dimension_numbers = #tpu.dot_dimension_numbers<[1], [0], [0], [1], [0, 0, 1, 1], [], []>} : vector<16x16xbf16>, vector<16x16xbf16>, vector<16x16xf32> -> vector<16x16xf32>
    %79 = arith.truncf %78 : vector<16x16xf32> to vector<16x16xbf16>
    %c4 = arith.constant 4 : index
    %c0_28 = arith.constant 0 : index
    %c0_29 = arith.constant 0 : index
    %80 = vector.load %arg3[%c4, %c0_28, %c0_29] : memref<7x16x32xbf16, #tpu.memory_space<vmem>>, vector<1x16x32xbf16>
    %81 = vector.shape_cast %80 : vector<1x16x32xbf16> to vector<16x32xbf16>
    %cst_30 = arith.constant dense<0.000000e+00> : vector<16x32xf32>
    %82 = tpu.matmul %79, %81, %cst_30 {dimension_numbers = #tpu.dot_dimension_numbers<[1], [0], [0], [1], [0, 0, 1, 1], [], []>} : vector<16x16xbf16>, vector<16x32xbf16>, vector<16x32xf32> -> vector<16x32xf32>
    %83 = arith.addf %69, %82 : vector<16x32xf32>
    %c1_i32_31 = arith.constant 1 : i32
    %84 = vector.broadcast %c1_i32_31 : i32 to vector<16x16xi32>
    %85 = arith.muli %84, %10 : vector<16x16xi32>
    %c2_i32 = arith.constant 2 : i32
    %86 = vector.broadcast %c2_i32 : i32 to vector<16x16xi32>
    %87 = arith.addi %85, %86 : vector<16x16xi32>
    %88 = arith.cmpi eq, %11, %87 : vector<16x16xi32>
    %89 = arith.extui %88 : vector<16x16xi1> to vector<16x16xi32>
    %90 = arith.sitofp %89 : vector<16x16xi32> to vector<16x16xf32>
    %91 = arith.truncf %90 : vector<16x16xf32> to vector<16x16xbf16>
    %cst_32 = arith.constant dense<0.000000e+00> : vector<16x16xf32>
    %92 = tpu.matmul %91, %12, %cst_32 {dimension_numbers = #tpu.dot_dimension_numbers<[1], [0], [0], [1], [0, 0, 1, 1], [], []>} : vector<16x16xbf16>, vector<16x16xbf16>, vector<16x16xf32> -> vector<16x16xf32>
    %93 = arith.truncf %92 : vector<16x16xf32> to vector<16x16xbf16>
    %c5 = arith.constant 5 : index
    %c0_33 = arith.constant 0 : index
    %c0_34 = arith.constant 0 : index
    %94 = vector.load %arg3[%c5, %c0_33, %c0_34] : memref<7x16x32xbf16, #tpu.memory_space<vmem>>, vector<1x16x32xbf16>
    %95 = vector.shape_cast %94 : vector<1x16x32xbf16> to vector<16x32xbf16>
    %cst_35 = arith.constant dense<0.000000e+00> : vector<16x32xf32>
    %96 = tpu.matmul %93, %95, %cst_35 {dimension_numbers = #tpu.dot_dimension_numbers<[1], [0], [0], [1], [0, 0, 1, 1], [], []>} : vector<16x16xbf16>, vector<16x32xbf16>, vector<16x32xf32> -> vector<16x32xf32>
    %97 = arith.addf %83, %96 : vector<16x32xf32>
    %c1_i32_36 = arith.constant 1 : i32
    %98 = vector.broadcast %c1_i32_36 : i32 to vector<16x16xi32>
    %99 = arith.muli %98, %10 : vector<16x16xi32>
    %c3_i32 = arith.constant 3 : i32
    %100 = vector.broadcast %c3_i32 : i32 to vector<16x16xi32>
    %101 = arith.addi %99, %100 : vector<16x16xi32>
    %102 = arith.cmpi eq, %11, %101 : vector<16x16xi32>
    %103 = arith.extui %102 : vector<16x16xi1> to vector<16x16xi32>
    %104 = arith.sitofp %103 : vector<16x16xi32> to vector<16x16xf32>
    %105 = arith.truncf %104 : vector<16x16xf32> to vector<16x16xbf16>
    %cst_37 = arith.constant dense<0.000000e+00> : vector<16x16xf32>
    %106 = tpu.matmul %105, %12, %cst_37 {dimension_numbers = #tpu.dot_dimension_numbers<[1], [0], [0], [1], [0, 0, 1, 1], [], []>} : vector<16x16xbf16>, vector<16x16xbf16>, vector<16x16xf32> -> vector<16x16xf32>
    %107 = arith.truncf %106 : vector<16x16xf32> to vector<16x16xbf16>
    %c6 = arith.constant 6 : index
    %c0_38 = arith.constant 0 : index
    %c0_39 = arith.constant 0 : index
    %108 = vector.load %arg3[%c6, %c0_38, %c0_39] : memref<7x16x32xbf16, #tpu.memory_space<vmem>>, vector<1x16x32xbf16>
    %109 = vector.shape_cast %108 : vector<1x16x32xbf16> to vector<16x32xbf16>
    %cst_40 = arith.constant dense<0.000000e+00> : vector<16x32xf32>
    %110 = tpu.matmul %107, %109, %cst_40 {dimension_numbers = #tpu.dot_dimension_numbers<[1], [0], [0], [1], [0, 0, 1, 1], [], []>} : vector<16x16xbf16>, vector<16x32xbf16>, vector<16x32xf32> -> vector<16x32xf32>
    %111 = arith.addf %97, %110 : vector<16x32xf32>
    %c0_41 = arith.constant 0 : index
    %c0_42 = arith.constant 0 : index
    %112 = vector.load %arg4[%c0_41, %c0_42] : memref<1x32xf32, #tpu.memory_space<vmem>>, vector<1x32xf32>
    %113 = vector.broadcast %112 : vector<1x32xf32> to vector<16x32xf32>
    %114 = arith.addf %111, %113 : vector<16x32xf32>
    %cst_43 = arith.constant 0.000000e+00 : f32
    %115 = vector.broadcast %cst_43 : f32 to vector<16x32xf32>
    %116 = arith.maximumf %114, %115 : vector<16x32xf32>
    %117 = tpu.iota {dimensions = array<i32: 0>} : vector<8x16xi32>
    %118 = tpu.iota {dimensions = array<i32: 1>} : vector<8x16xi32>
    %119 = arith.truncf %116 : vector<16x32xf32> to vector<16x32xbf16>
    %cst_44 = arith.constant 0.000000e+00 : f32
    %120 = vector.broadcast %cst_44 : f32 to vector<8x32xf32>
    %c2_i32_45 = arith.constant 2 : i32
    %121 = vector.broadcast %c2_i32_45 : i32 to vector<8x16xi32>
    %122 = arith.muli %121, %117 : vector<8x16xi32>
    %c-1_i32_46 = arith.constant -1 : i32
    %123 = vector.broadcast %c-1_i32_46 : i32 to vector<8x16xi32>
    %124 = arith.addi %122, %123 : vector<8x16xi32>
    %125 = arith.cmpi eq, %118, %124 : vector<8x16xi32>
    %126 = arith.extui %125 : vector<8x16xi1> to vector<8x16xi32>
    %127 = arith.sitofp %126 : vector<8x16xi32> to vector<8x16xf32>
    %128 = arith.truncf %127 : vector<8x16xf32> to vector<8x16xbf16>
    %cst_47 = arith.constant dense<0.000000e+00> : vector<8x32xf32>
    %129 = tpu.matmul %128, %119, %cst_47 {dimension_numbers = #tpu.dot_dimension_numbers<[1], [0], [0], [1], [0, 0, 1, 1], [], []>} : vector<8x16xbf16>, vector<16x32xbf16>, vector<8x32xf32> -> vector<8x32xf32>
    %130 = arith.truncf %129 : vector<8x32xf32> to vector<8x32xbf16>
    %c0_48 = arith.constant 0 : index
    %c0_49 = arith.constant 0 : index
    %c0_50 = arith.constant 0 : index
    %131 = vector.load %arg5[%c0_48, %c0_49, %c0_50] : memref<3x32x32xbf16, #tpu.memory_space<vmem>>, vector<1x32x32xbf16>
    %132 = vector.shape_cast %131 : vector<1x32x32xbf16> to vector<32x32xbf16>
    %cst_51 = arith.constant dense<0.000000e+00> : vector<8x32xf32>
    %133 = tpu.matmul %130, %132, %cst_51 {dimension_numbers = #tpu.dot_dimension_numbers<[1], [0], [0], [1], [0, 0, 1, 1], [], []>} : vector<8x32xbf16>, vector<32x32xbf16>, vector<8x32xf32> -> vector<8x32xf32>
    %134 = arith.addf %120, %133 : vector<8x32xf32>
    %c2_i32_52 = arith.constant 2 : i32
    %135 = vector.broadcast %c2_i32_52 : i32 to vector<8x16xi32>
    %136 = arith.muli %135, %117 : vector<8x16xi32>
    %c0_i32_53 = arith.constant 0 : i32
    %137 = vector.broadcast %c0_i32_53 : i32 to vector<8x16xi32>
    %138 = arith.addi %136, %137 : vector<8x16xi32>
    %139 = arith.cmpi eq, %118, %138 : vector<8x16xi32>
    %140 = arith.extui %139 : vector<8x16xi1> to vector<8x16xi32>
    %141 = arith.sitofp %140 : vector<8x16xi32> to vector<8x16xf32>
    %142 = arith.truncf %141 : vector<8x16xf32> to vector<8x16xbf16>
    %cst_54 = arith.constant dense<0.000000e+00> : vector<8x32xf32>
    %143 = tpu.matmul %142, %119, %cst_54 {dimension_numbers = #tpu.dot_dimension_numbers<[1], [0], [0], [1], [0, 0, 1, 1], [], []>} : vector<8x16xbf16>, vector<16x32xbf16>, vector<8x32xf32> -> vector<8x32xf32>
    %144 = arith.truncf %143 : vector<8x32xf32> to vector<8x32xbf16>
    %c1_55 = arith.constant 1 : index
    %c0_56 = arith.constant 0 : index
    %c0_57 = arith.constant 0 : index
    %145 = vector.load %arg5[%c1_55, %c0_56, %c0_57] : memref<3x32x32xbf16, #tpu.memory_space<vmem>>, vector<1x32x32xbf16>
    %146 = vector.shape_cast %145 : vector<1x32x32xbf16> to vector<32x32xbf16>
    %cst_58 = arith.constant dense<0.000000e+00> : vector<8x32xf32>
    %147 = tpu.matmul %144, %146, %cst_58 {dimension_numbers = #tpu.dot_dimension_numbers<[1], [0], [0], [1], [0, 0, 1, 1], [], []>} : vector<8x32xbf16>, vector<32x32xbf16>, vector<8x32xf32> -> vector<8x32xf32>
    %148 = arith.addf %134, %147 : vector<8x32xf32>
    %c2_i32_59 = arith.constant 2 : i32
    %149 = vector.broadcast %c2_i32_59 : i32 to vector<8x16xi32>
    %150 = arith.muli %149, %117 : vector<8x16xi32>
    %c1_i32_60 = arith.constant 1 : i32
    %151 = vector.broadcast %c1_i32_60 : i32 to vector<8x16xi32>
    %152 = arith.addi %150, %151 : vector<8x16xi32>
    %153 = arith.cmpi eq, %118, %152 : vector<8x16xi32>
    %154 = arith.extui %153 : vector<8x16xi1> to vector<8x16xi32>
    %155 = arith.sitofp %154 : vector<8x16xi32> to vector<8x16xf32>
    %156 = arith.truncf %155 : vector<8x16xf32> to vector<8x16xbf16>
    %cst_61 = arith.constant dense<0.000000e+00> : vector<8x32xf32>
    %157 = tpu.matmul %156, %119, %cst_61 {dimension_numbers = #tpu.dot_dimension_numbers<[1], [0], [0], [1], [0, 0, 1, 1], [], []>} : vector<8x16xbf16>, vector<16x32xbf16>, vector<8x32xf32> -> vector<8x32xf32>
    %158 = arith.truncf %157 : vector<8x32xf32> to vector<8x32xbf16>
    %c2_62 = arith.constant 2 : index
    %c0_63 = arith.constant 0 : index
    %c0_64 = arith.constant 0 : index
    %159 = vector.load %arg5[%c2_62, %c0_63, %c0_64] : memref<3x32x32xbf16, #tpu.memory_space<vmem>>, vector<1x32x32xbf16>
    %160 = vector.shape_cast %159 : vector<1x32x32xbf16> to vector<32x32xbf16>
    %cst_65 = arith.constant dense<0.000000e+00> : vector<8x32xf32>
    %161 = tpu.matmul %158, %160, %cst_65 {dimension_numbers = #tpu.dot_dimension_numbers<[1], [0], [0], [1], [0, 0, 1, 1], [], []>} : vector<8x32xbf16>, vector<32x32xbf16>, vector<8x32xf32> -> vector<8x32xf32>
    %162 = arith.addf %148, %161 : vector<8x32xf32>
    %c0_66 = arith.constant 0 : index
    %c0_67 = arith.constant 0 : index
    %163 = vector.load %arg6[%c0_66, %c0_67] : memref<1x32xf32, #tpu.memory_space<vmem>>, vector<1x32xf32>
    %164 = vector.broadcast %163 : vector<1x32xf32> to vector<8x32xf32>
    %165 = arith.addf %162, %164 : vector<8x32xf32>
    %cst_68 = arith.constant 0.000000e+00 : f32
    %166 = vector.broadcast %cst_68 : f32 to vector<8x32xf32>
    %167 = arith.maximumf %165, %166 : vector<8x32xf32>
    %168 = tpu.iota {dimensions = array<i32: 0>} : vector<8x8xi32>
    %169 = tpu.iota {dimensions = array<i32: 1>} : vector<8x8xi32>
    %170 = arith.truncf %167 : vector<8x32xf32> to vector<8x32xbf16>
    %cst_69 = arith.constant 0.000000e+00 : f32
    %171 = vector.broadcast %cst_69 : f32 to vector<8x32xf32>
    %c1_i32_70 = arith.constant 1 : i32
    %172 = vector.broadcast %c1_i32_70 : i32 to vector<8x8xi32>
    %173 = arith.muli %172, %168 : vector<8x8xi32>
    %c-3_i32_71 = arith.constant -3 : i32
    %174 = vector.broadcast %c-3_i32_71 : i32 to vector<8x8xi32>
    %175 = arith.addi %173, %174 : vector<8x8xi32>
    %176 = arith.cmpi eq, %169, %175 : vector<8x8xi32>
    %177 = arith.extui %176 : vector<8x8xi1> to vector<8x8xi32>
    %178 = arith.sitofp %177 : vector<8x8xi32> to vector<8x8xf32>
    %179 = arith.truncf %178 : vector<8x8xf32> to vector<8x8xbf16>
    %cst_72 = arith.constant dense<0.000000e+00> : vector<8x32xf32>
    %180 = tpu.matmul %179, %170, %cst_72 {dimension_numbers = #tpu.dot_dimension_numbers<[1], [0], [0], [1], [0, 0, 1, 1], [], []>} : vector<8x8xbf16>, vector<8x32xbf16>, vector<8x32xf32> -> vector<8x32xf32>
    %181 = arith.truncf %180 : vector<8x32xf32> to vector<8x32xbf16>
    %c0_73 = arith.constant 0 : index
    %c0_74 = arith.constant 0 : index
    %c0_75 = arith.constant 0 : index
    %182 = vector.load %arg7[%c0_73, %c0_74, %c0_75] : memref<7x32x32xbf16, #tpu.memory_space<vmem>>, vector<1x32x32xbf16>
    %183 = vector.shape_cast %182 : vector<1x32x32xbf16> to vector<32x32xbf16>
    %cst_76 = arith.constant dense<0.000000e+00> : vector<8x32xf32>
    %184 = tpu.matmul %181, %183, %cst_76 {dimension_numbers = #tpu.dot_dimension_numbers<[1], [0], [0], [1], [0, 0, 1, 1], [], []>} : vector<8x32xbf16>, vector<32x32xbf16>, vector<8x32xf32> -> vector<8x32xf32>
    %185 = arith.addf %171, %184 : vector<8x32xf32>
    %c1_i32_77 = arith.constant 1 : i32
    %186 = vector.broadcast %c1_i32_77 : i32 to vector<8x8xi32>
    %187 = arith.muli %186, %168 : vector<8x8xi32>
    %c-2_i32_78 = arith.constant -2 : i32
    %188 = vector.broadcast %c-2_i32_78 : i32 to vector<8x8xi32>
    %189 = arith.addi %187, %188 : vector<8x8xi32>
    %190 = arith.cmpi eq, %169, %189 : vector<8x8xi32>
    %191 = arith.extui %190 : vector<8x8xi1> to vector<8x8xi32>
    %192 = arith.sitofp %191 : vector<8x8xi32> to vector<8x8xf32>
    %193 = arith.truncf %192 : vector<8x8xf32> to vector<8x8xbf16>
    %cst_79 = arith.constant dense<0.000000e+00> : vector<8x32xf32>
    %194 = tpu.matmul %193, %170, %cst_79 {dimension_numbers = #tpu.dot_dimension_numbers<[1], [0], [0], [1], [0, 0, 1, 1], [], []>} : vector<8x8xbf16>, vector<8x32xbf16>, vector<8x32xf32> -> vector<8x32xf32>
    %195 = arith.truncf %194 : vector<8x32xf32> to vector<8x32xbf16>
    %c1_80 = arith.constant 1 : index
    %c0_81 = arith.constant 0 : index
    %c0_82 = arith.constant 0 : index
    %196 = vector.load %arg7[%c1_80, %c0_81, %c0_82] : memref<7x32x32xbf16, #tpu.memory_space<vmem>>, vector<1x32x32xbf16>
    %197 = vector.shape_cast %196 : vector<1x32x32xbf16> to vector<32x32xbf16>
    %cst_83 = arith.constant dense<0.000000e+00> : vector<8x32xf32>
    %198 = tpu.matmul %195, %197, %cst_83 {dimension_numbers = #tpu.dot_dimension_numbers<[1], [0], [0], [1], [0, 0, 1, 1], [], []>} : vector<8x32xbf16>, vector<32x32xbf16>, vector<8x32xf32> -> vector<8x32xf32>
    %199 = arith.addf %185, %198 : vector<8x32xf32>
    %c1_i32_84 = arith.constant 1 : i32
    %200 = vector.broadcast %c1_i32_84 : i32 to vector<8x8xi32>
    %201 = arith.muli %200, %168 : vector<8x8xi32>
    %c-1_i32_85 = arith.constant -1 : i32
    %202 = vector.broadcast %c-1_i32_85 : i32 to vector<8x8xi32>
    %203 = arith.addi %201, %202 : vector<8x8xi32>
    %204 = arith.cmpi eq, %169, %203 : vector<8x8xi32>
    %205 = arith.extui %204 : vector<8x8xi1> to vector<8x8xi32>
    %206 = arith.sitofp %205 : vector<8x8xi32> to vector<8x8xf32>
    %207 = arith.truncf %206 : vector<8x8xf32> to vector<8x8xbf16>
    %cst_86 = arith.constant dense<0.000000e+00> : vector<8x32xf32>
    %208 = tpu.matmul %207, %170, %cst_86 {dimension_numbers = #tpu.dot_dimension_numbers<[1], [0], [0], [1], [0, 0, 1, 1], [], []>} : vector<8x8xbf16>, vector<8x32xbf16>, vector<8x32xf32> -> vector<8x32xf32>
    %209 = arith.truncf %208 : vector<8x32xf32> to vector<8x32xbf16>
    %c2_87 = arith.constant 2 : index
    %c0_88 = arith.constant 0 : index
    %c0_89 = arith.constant 0 : index
    %210 = vector.load %arg7[%c2_87, %c0_88, %c0_89] : memref<7x32x32xbf16, #tpu.memory_space<vmem>>, vector<1x32x32xbf16>
    %211 = vector.shape_cast %210 : vector<1x32x32xbf16> to vector<32x32xbf16>
    %cst_90 = arith.constant dense<0.000000e+00> : vector<8x32xf32>
    %212 = tpu.matmul %209, %211, %cst_90 {dimension_numbers = #tpu.dot_dimension_numbers<[1], [0], [0], [1], [0, 0, 1, 1], [], []>} : vector<8x32xbf16>, vector<32x32xbf16>, vector<8x32xf32> -> vector<8x32xf32>
    %213 = arith.addf %199, %212 : vector<8x32xf32>
    %c1_i32_91 = arith.constant 1 : i32
    %214 = vector.broadcast %c1_i32_91 : i32 to vector<8x8xi32>
    %215 = arith.muli %214, %168 : vector<8x8xi32>
    %c0_i32_92 = arith.constant 0 : i32
    %216 = vector.broadcast %c0_i32_92 : i32 to vector<8x8xi32>
    %217 = arith.addi %215, %216 : vector<8x8xi32>
    %218 = arith.cmpi eq, %169, %217 : vector<8x8xi32>
    %219 = arith.extui %218 : vector<8x8xi1> to vector<8x8xi32>
    %220 = arith.sitofp %219 : vector<8x8xi32> to vector<8x8xf32>
    %221 = arith.truncf %220 : vector<8x8xf32> to vector<8x8xbf16>
    %cst_93 = arith.constant dense<0.000000e+00> : vector<8x32xf32>
    %222 = tpu.matmul %221, %170, %cst_93 {dimension_numbers = #tpu.dot_dimension_numbers<[1], [0], [0], [1], [0, 0, 1, 1], [], []>} : vector<8x8xbf16>, vector<8x32xbf16>, vector<8x32xf32> -> vector<8x32xf32>
    %223 = arith.truncf %222 : vector<8x32xf32> to vector<8x32xbf16>
    %c3_94 = arith.constant 3 : index
    %c0_95 = arith.constant 0 : index
    %c0_96 = arith.constant 0 : index
    %224 = vector.load %arg7[%c3_94, %c0_95, %c0_96] : memref<7x32x32xbf16, #tpu.memory_space<vmem>>, vector<1x32x32xbf16>
    %225 = vector.shape_cast %224 : vector<1x32x32xbf16> to vector<32x32xbf16>
    %cst_97 = arith.constant dense<0.000000e+00> : vector<8x32xf32>
    %226 = tpu.matmul %223, %225, %cst_97 {dimension_numbers = #tpu.dot_dimension_numbers<[1], [0], [0], [1], [0, 0, 1, 1], [], []>} : vector<8x32xbf16>, vector<32x32xbf16>, vector<8x32xf32> -> vector<8x32xf32>
    %227 = arith.addf %213, %226 : vector<8x32xf32>
    %c1_i32_98 = arith.constant 1 : i32
    %228 = vector.broadcast %c1_i32_98 : i32 to vector<8x8xi32>
    %229 = arith.muli %228, %168 : vector<8x8xi32>
    %c1_i32_99 = arith.constant 1 : i32
    %230 = vector.broadcast %c1_i32_99 : i32 to vector<8x8xi32>
    %231 = arith.addi %229, %230 : vector<8x8xi32>
    %232 = arith.cmpi eq, %169, %231 : vector<8x8xi32>
    %233 = arith.extui %232 : vector<8x8xi1> to vector<8x8xi32>
    %234 = arith.sitofp %233 : vector<8x8xi32> to vector<8x8xf32>
    %235 = arith.truncf %234 : vector<8x8xf32> to vector<8x8xbf16>
    %cst_100 = arith.constant dense<0.000000e+00> : vector<8x32xf32>
    %236 = tpu.matmul %235, %170, %cst_100 {dimension_numbers = #tpu.dot_dimension_numbers<[1], [0], [0], [1], [0, 0, 1, 1], [], []>} : vector<8x8xbf16>, vector<8x32xbf16>, vector<8x32xf32> -> vector<8x32xf32>
    %237 = arith.truncf %236 : vector<8x32xf32> to vector<8x32xbf16>
    %c4_101 = arith.constant 4 : index
    %c0_102 = arith.constant 0 : index
    %c0_103 = arith.constant 0 : index
    %238 = vector.load %arg7[%c4_101, %c0_102, %c0_103] : memref<7x32x32xbf16, #tpu.memory_space<vmem>>, vector<1x32x32xbf16>
    %239 = vector.shape_cast %238 : vector<1x32x32xbf16> to vector<32x32xbf16>
    %cst_104 = arith.constant dense<0.000000e+00> : vector<8x32xf32>
    %240 = tpu.matmul %237, %239, %cst_104 {dimension_numbers = #tpu.dot_dimension_numbers<[1], [0], [0], [1], [0, 0, 1, 1], [], []>} : vector<8x32xbf16>, vector<32x32xbf16>, vector<8x32xf32> -> vector<8x32xf32>
    %241 = arith.addf %227, %240 : vector<8x32xf32>
    %c1_i32_105 = arith.constant 1 : i32
    %242 = vector.broadcast %c1_i32_105 : i32 to vector<8x8xi32>
    %243 = arith.muli %242, %168 : vector<8x8xi32>
    %c2_i32_106 = arith.constant 2 : i32
    %244 = vector.broadcast %c2_i32_106 : i32 to vector<8x8xi32>
    %245 = arith.addi %243, %244 : vector<8x8xi32>
    %246 = arith.cmpi eq, %169, %245 : vector<8x8xi32>
    %247 = arith.extui %246 : vector<8x8xi1> to vector<8x8xi32>
    %248 = arith.sitofp %247 : vector<8x8xi32> to vector<8x8xf32>
    %249 = arith.truncf %248 : vector<8x8xf32> to vector<8x8xbf16>
    %cst_107 = arith.constant dense<0.000000e+00> : vector<8x32xf32>
    %250 = tpu.matmul %249, %170, %cst_107 {dimension_numbers = #tpu.dot_dimension_numbers<[1], [0], [0], [1], [0, 0, 1, 1], [], []>} : vector<8x8xbf16>, vector<8x32xbf16>, vector<8x32xf32> -> vector<8x32xf32>
    %251 = arith.truncf %250 : vector<8x32xf32> to vector<8x32xbf16>
    %c5_108 = arith.constant 5 : index
    %c0_109 = arith.constant 0 : index
    %c0_110 = arith.constant 0 : index
    %252 = vector.load %arg7[%c5_108, %c0_109, %c0_110] : memref<7x32x32xbf16, #tpu.memory_space<vmem>>, vector<1x32x32xbf16>
    %253 = vector.shape_cast %252 : vector<1x32x32xbf16> to vector<32x32xbf16>
    %cst_111 = arith.constant dense<0.000000e+00> : vector<8x32xf32>
    %254 = tpu.matmul %251, %253, %cst_111 {dimension_numbers = #tpu.dot_dimension_numbers<[1], [0], [0], [1], [0, 0, 1, 1], [], []>} : vector<8x32xbf16>, vector<32x32xbf16>, vector<8x32xf32> -> vector<8x32xf32>
    %255 = arith.addf %241, %254 : vector<8x32xf32>
    %c1_i32_112 = arith.constant 1 : i32
    %256 = vector.broadcast %c1_i32_112 : i32 to vector<8x8xi32>
    %257 = arith.muli %256, %168 : vector<8x8xi32>
    %c3_i32_113 = arith.constant 3 : i32
    %258 = vector.broadcast %c3_i32_113 : i32 to vector<8x8xi32>
    %259 = arith.addi %257, %258 : vector<8x8xi32>
    %260 = arith.cmpi eq, %169, %259 : vector<8x8xi32>
    %261 = arith.extui %260 : vector<8x8xi1> to vector<8x8xi32>
    %262 = arith.sitofp %261 : vector<8x8xi32> to vector<8x8xf32>
    %263 = arith.truncf %262 : vector<8x8xf32> to vector<8x8xbf16>
    %cst_114 = arith.constant dense<0.000000e+00> : vector<8x32xf32>
    %264 = tpu.matmul %263, %170, %cst_114 {dimension_numbers = #tpu.dot_dimension_numbers<[1], [0], [0], [1], [0, 0, 1, 1], [], []>} : vector<8x8xbf16>, vector<8x32xbf16>, vector<8x32xf32> -> vector<8x32xf32>
    %265 = arith.truncf %264 : vector<8x32xf32> to vector<8x32xbf16>
    %c6_115 = arith.constant 6 : index
    %c0_116 = arith.constant 0 : index
    %c0_117 = arith.constant 0 : index
    %266 = vector.load %arg7[%c6_115, %c0_116, %c0_117] : memref<7x32x32xbf16, #tpu.memory_space<vmem>>, vector<1x32x32xbf16>
    %267 = vector.shape_cast %266 : vector<1x32x32xbf16> to vector<32x32xbf16>
    %cst_118 = arith.constant dense<0.000000e+00> : vector<8x32xf32>
    %268 = tpu.matmul %265, %267, %cst_118 {dimension_numbers = #tpu.dot_dimension_numbers<[1], [0], [0], [1], [0, 0, 1, 1], [], []>} : vector<8x32xbf16>, vector<32x32xbf16>, vector<8x32xf32> -> vector<8x32xf32>
    %269 = arith.addf %255, %268 : vector<8x32xf32>
    %c0_119 = arith.constant 0 : index
    %c0_120 = arith.constant 0 : index
    %270 = vector.load %arg8[%c0_119, %c0_120] : memref<1x32xf32, #tpu.memory_space<vmem>>, vector<1x32xf32>
    %271 = vector.broadcast %270 : vector<1x32xf32> to vector<8x32xf32>
    %272 = arith.addf %269, %271 : vector<8x32xf32>
    %cst_121 = arith.constant 0.000000e+00 : f32
    %273 = vector.broadcast %cst_121 : f32 to vector<8x32xf32>
    %274 = arith.maximumf %272, %273 : vector<8x32xf32>
    %275 = tpu.iota {dimensions = array<i32: 0>} : vector<4x8xi32>
    %276 = tpu.iota {dimensions = array<i32: 1>} : vector<4x8xi32>
    %277 = arith.truncf %274 : vector<8x32xf32> to vector<8x32xbf16>
    %cst_122 = arith.constant 0.000000e+00 : f32
    %278 = vector.broadcast %cst_122 : f32 to vector<4x32xf32>
    %c2_i32_123 = arith.constant 2 : i32
    %279 = vector.broadcast %c2_i32_123 : i32 to vector<4x8xi32>
    %280 = arith.muli %279, %275 : vector<4x8xi32>
    %c-1_i32_124 = arith.constant -1 : i32
    %281 = vector.broadcast %c-1_i32_124 : i32 to vector<4x8xi32>
    %282 = arith.addi %280, %281 : vector<4x8xi32>
    %283 = arith.cmpi eq, %276, %282 : vector<4x8xi32>
    %284 = arith.extui %283 : vector<4x8xi1> to vector<4x8xi32>
    %285 = arith.sitofp %284 : vector<4x8xi32> to vector<4x8xf32>
    %286 = arith.truncf %285 : vector<4x8xf32> to vector<4x8xbf16>
    %cst_125 = arith.constant dense<0.000000e+00> : vector<4x32xf32>
    %287 = tpu.matmul %286, %277, %cst_125 {dimension_numbers = #tpu.dot_dimension_numbers<[1], [0], [0], [1], [0, 0, 1, 1], [], []>} : vector<4x8xbf16>, vector<8x32xbf16>, vector<4x32xf32> -> vector<4x32xf32>
    %288 = arith.truncf %287 : vector<4x32xf32> to vector<4x32xbf16>
    %c0_126 = arith.constant 0 : index
    %c0_127 = arith.constant 0 : index
    %c0_128 = arith.constant 0 : index
    %289 = vector.load %arg9[%c0_126, %c0_127, %c0_128] : memref<3x32x32xbf16, #tpu.memory_space<vmem>>, vector<1x32x32xbf16>
    %290 = vector.shape_cast %289 : vector<1x32x32xbf16> to vector<32x32xbf16>
    %cst_129 = arith.constant dense<0.000000e+00> : vector<4x32xf32>
    %291 = tpu.matmul %288, %290, %cst_129 {dimension_numbers = #tpu.dot_dimension_numbers<[1], [0], [0], [1], [0, 0, 1, 1], [], []>} : vector<4x32xbf16>, vector<32x32xbf16>, vector<4x32xf32> -> vector<4x32xf32>
    %292 = arith.addf %278, %291 : vector<4x32xf32>
    %c2_i32_130 = arith.constant 2 : i32
    %293 = vector.broadcast %c2_i32_130 : i32 to vector<4x8xi32>
    %294 = arith.muli %293, %275 : vector<4x8xi32>
    %c0_i32_131 = arith.constant 0 : i32
    %295 = vector.broadcast %c0_i32_131 : i32 to vector<4x8xi32>
    %296 = arith.addi %294, %295 : vector<4x8xi32>
    %297 = arith.cmpi eq, %276, %296 : vector<4x8xi32>
    %298 = arith.extui %297 : vector<4x8xi1> to vector<4x8xi32>
    %299 = arith.sitofp %298 : vector<4x8xi32> to vector<4x8xf32>
    %300 = arith.truncf %299 : vector<4x8xf32> to vector<4x8xbf16>
    %cst_132 = arith.constant dense<0.000000e+00> : vector<4x32xf32>
    %301 = tpu.matmul %300, %277, %cst_132 {dimension_numbers = #tpu.dot_dimension_numbers<[1], [0], [0], [1], [0, 0, 1, 1], [], []>} : vector<4x8xbf16>, vector<8x32xbf16>, vector<4x32xf32> -> vector<4x32xf32>
    %302 = arith.truncf %301 : vector<4x32xf32> to vector<4x32xbf16>
    %c1_133 = arith.constant 1 : index
    %c0_134 = arith.constant 0 : index
    %c0_135 = arith.constant 0 : index
    %303 = vector.load %arg9[%c1_133, %c0_134, %c0_135] : memref<3x32x32xbf16, #tpu.memory_space<vmem>>, vector<1x32x32xbf16>
    %304 = vector.shape_cast %303 : vector<1x32x32xbf16> to vector<32x32xbf16>
    %cst_136 = arith.constant dense<0.000000e+00> : vector<4x32xf32>
    %305 = tpu.matmul %302, %304, %cst_136 {dimension_numbers = #tpu.dot_dimension_numbers<[1], [0], [0], [1], [0, 0, 1, 1], [], []>} : vector<4x32xbf16>, vector<32x32xbf16>, vector<4x32xf32> -> vector<4x32xf32>
    %306 = arith.addf %292, %305 : vector<4x32xf32>
    %c2_i32_137 = arith.constant 2 : i32
    %307 = vector.broadcast %c2_i32_137 : i32 to vector<4x8xi32>
    %308 = arith.muli %307, %275 : vector<4x8xi32>
    %c1_i32_138 = arith.constant 1 : i32
    %309 = vector.broadcast %c1_i32_138 : i32 to vector<4x8xi32>
    %310 = arith.addi %308, %309 : vector<4x8xi32>
    %311 = arith.cmpi eq, %276, %310 : vector<4x8xi32>
    %312 = arith.extui %311 : vector<4x8xi1> to vector<4x8xi32>
    %313 = arith.sitofp %312 : vector<4x8xi32> to vector<4x8xf32>
    %314 = arith.truncf %313 : vector<4x8xf32> to vector<4x8xbf16>
    %cst_139 = arith.constant dense<0.000000e+00> : vector<4x32xf32>
    %315 = tpu.matmul %314, %277, %cst_139 {dimension_numbers = #tpu.dot_dimension_numbers<[1], [0], [0], [1], [0, 0, 1, 1], [], []>} : vector<4x8xbf16>, vector<8x32xbf16>, vector<4x32xf32> -> vector<4x32xf32>
    %316 = arith.truncf %315 : vector<4x32xf32> to vector<4x32xbf16>
    %c2_140 = arith.constant 2 : index
    %c0_141 = arith.constant 0 : index
    %c0_142 = arith.constant 0 : index
    %317 = vector.load %arg9[%c2_140, %c0_141, %c0_142] : memref<3x32x32xbf16, #tpu.memory_space<vmem>>, vector<1x32x32xbf16>
    %318 = vector.shape_cast %317 : vector<1x32x32xbf16> to vector<32x32xbf16>
    %cst_143 = arith.constant dense<0.000000e+00> : vector<4x32xf32>
    %319 = tpu.matmul %316, %318, %cst_143 {dimension_numbers = #tpu.dot_dimension_numbers<[1], [0], [0], [1], [0, 0, 1, 1], [], []>} : vector<4x32xbf16>, vector<32x32xbf16>, vector<4x32xf32> -> vector<4x32xf32>
    %320 = arith.addf %306, %319 : vector<4x32xf32>
    %c0_144 = arith.constant 0 : index
    %c0_145 = arith.constant 0 : index
    %321 = vector.load %arg10[%c0_144, %c0_145] : memref<1x32xf32, #tpu.memory_space<vmem>>, vector<1x32xf32>
    %322 = vector.broadcast %321 : vector<1x32xf32> to vector<4x32xf32>
    %323 = arith.addf %320, %322 : vector<4x32xf32>
    %cst_146 = arith.constant 0.000000e+00 : f32
    %324 = vector.broadcast %cst_146 : f32 to vector<4x32xf32>
    %325 = arith.maximumf %323, %324 : vector<4x32xf32>
    %326 = tpu.iota {dimensions = array<i32: 0>} : vector<2x4xi32>
    %327 = tpu.iota {dimensions = array<i32: 1>} : vector<2x4xi32>
    %328 = arith.truncf %325 : vector<4x32xf32> to vector<4x32xbf16>
    %cst_147 = arith.constant 0.000000e+00 : f32
    %329 = vector.broadcast %cst_147 : f32 to vector<2x32xf32>
    %c2_i32_148 = arith.constant 2 : i32
    %330 = vector.broadcast %c2_i32_148 : i32 to vector<2x4xi32>
    %331 = arith.muli %330, %326 : vector<2x4xi32>
    %c-1_i32_149 = arith.constant -1 : i32
    %332 = vector.broadcast %c-1_i32_149 : i32 to vector<2x4xi32>
    %333 = arith.addi %331, %332 : vector<2x4xi32>
    %334 = arith.cmpi eq, %327, %333 : vector<2x4xi32>
    %335 = arith.extui %334 : vector<2x4xi1> to vector<2x4xi32>
    %336 = arith.sitofp %335 : vector<2x4xi32> to vector<2x4xf32>
    %337 = arith.truncf %336 : vector<2x4xf32> to vector<2x4xbf16>
    %cst_150 = arith.constant dense<0.000000e+00> : vector<2x32xf32>
    %338 = tpu.matmul %337, %328, %cst_150 {dimension_numbers = #tpu.dot_dimension_numbers<[1], [0], [0], [1], [0, 0, 1, 1], [], []>} : vector<2x4xbf16>, vector<4x32xbf16>, vector<2x32xf32> -> vector<2x32xf32>
    %339 = arith.truncf %338 : vector<2x32xf32> to vector<2x32xbf16>
    %c0_151 = arith.constant 0 : index
    %c0_152 = arith.constant 0 : index
    %c0_153 = arith.constant 0 : index
    %340 = vector.load %arg11[%c0_151, %c0_152, %c0_153] : memref<3x32x32xbf16, #tpu.memory_space<vmem>>, vector<1x32x32xbf16>
    %341 = vector.shape_cast %340 : vector<1x32x32xbf16> to vector<32x32xbf16>
    %cst_154 = arith.constant dense<0.000000e+00> : vector<2x32xf32>
    %342 = tpu.matmul %339, %341, %cst_154 {dimension_numbers = #tpu.dot_dimension_numbers<[1], [0], [0], [1], [0, 0, 1, 1], [], []>} : vector<2x32xbf16>, vector<32x32xbf16>, vector<2x32xf32> -> vector<2x32xf32>
    %343 = arith.addf %329, %342 : vector<2x32xf32>
    %c2_i32_155 = arith.constant 2 : i32
    %344 = vector.broadcast %c2_i32_155 : i32 to vector<2x4xi32>
    %345 = arith.muli %344, %326 : vector<2x4xi32>
    %c0_i32_156 = arith.constant 0 : i32
    %346 = vector.broadcast %c0_i32_156 : i32 to vector<2x4xi32>
    %347 = arith.addi %345, %346 : vector<2x4xi32>
    %348 = arith.cmpi eq, %327, %347 : vector<2x4xi32>
    %349 = arith.extui %348 : vector<2x4xi1> to vector<2x4xi32>
    %350 = arith.sitofp %349 : vector<2x4xi32> to vector<2x4xf32>
    %351 = arith.truncf %350 : vector<2x4xf32> to vector<2x4xbf16>
    %cst_157 = arith.constant dense<0.000000e+00> : vector<2x32xf32>
    %352 = tpu.matmul %351, %328, %cst_157 {dimension_numbers = #tpu.dot_dimension_numbers<[1], [0], [0], [1], [0, 0, 1, 1], [], []>} : vector<2x4xbf16>, vector<4x32xbf16>, vector<2x32xf32> -> vector<2x32xf32>
    %353 = arith.truncf %352 : vector<2x32xf32> to vector<2x32xbf16>
    %c1_158 = arith.constant 1 : index
    %c0_159 = arith.constant 0 : index
    %c0_160 = arith.constant 0 : index
    %354 = vector.load %arg11[%c1_158, %c0_159, %c0_160] : memref<3x32x32xbf16, #tpu.memory_space<vmem>>, vector<1x32x32xbf16>
    %355 = vector.shape_cast %354 : vector<1x32x32xbf16> to vector<32x32xbf16>
    %cst_161 = arith.constant dense<0.000000e+00> : vector<2x32xf32>
    %356 = tpu.matmul %353, %355, %cst_161 {dimension_numbers = #tpu.dot_dimension_numbers<[1], [0], [0], [1], [0, 0, 1, 1], [], []>} : vector<2x32xbf16>, vector<32x32xbf16>, vector<2x32xf32> -> vector<2x32xf32>
    %357 = arith.addf %343, %356 : vector<2x32xf32>
    %c2_i32_162 = arith.constant 2 : i32
    %358 = vector.broadcast %c2_i32_162 : i32 to vector<2x4xi32>
    %359 = arith.muli %358, %326 : vector<2x4xi32>
    %c1_i32_163 = arith.constant 1 : i32
    %360 = vector.broadcast %c1_i32_163 : i32 to vector<2x4xi32>
    %361 = arith.addi %359, %360 : vector<2x4xi32>
    %362 = arith.cmpi eq, %327, %361 : vector<2x4xi32>
    %363 = arith.extui %362 : vector<2x4xi1> to vector<2x4xi32>
    %364 = arith.sitofp %363 : vector<2x4xi32> to vector<2x4xf32>
    %365 = arith.truncf %364 : vector<2x4xf32> to vector<2x4xbf16>
    %cst_164 = arith.constant dense<0.000000e+00> : vector<2x32xf32>
    %366 = tpu.matmul %365, %328, %cst_164 {dimension_numbers = #tpu.dot_dimension_numbers<[1], [0], [0], [1], [0, 0, 1, 1], [], []>} : vector<2x4xbf16>, vector<4x32xbf16>, vector<2x32xf32> -> vector<2x32xf32>
    %367 = arith.truncf %366 : vector<2x32xf32> to vector<2x32xbf16>
    %c2_165 = arith.constant 2 : index
    %c0_166 = arith.constant 0 : index
    %c0_167 = arith.constant 0 : index
    %368 = vector.load %arg11[%c2_165, %c0_166, %c0_167] : memref<3x32x32xbf16, #tpu.memory_space<vmem>>, vector<1x32x32xbf16>
    %369 = vector.shape_cast %368 : vector<1x32x32xbf16> to vector<32x32xbf16>
    %cst_168 = arith.constant dense<0.000000e+00> : vector<2x32xf32>
    %370 = tpu.matmul %367, %369, %cst_168 {dimension_numbers = #tpu.dot_dimension_numbers<[1], [0], [0], [1], [0, 0, 1, 1], [], []>} : vector<2x32xbf16>, vector<32x32xbf16>, vector<2x32xf32> -> vector<2x32xf32>
    %371 = arith.addf %357, %370 : vector<2x32xf32>
    %c0_169 = arith.constant 0 : index
    %c0_170 = arith.constant 0 : index
    %372 = vector.load %arg12[%c0_169, %c0_170] : memref<1x32xf32, #tpu.memory_space<vmem>>, vector<1x32xf32>
    %373 = vector.broadcast %372 : vector<1x32xf32> to vector<2x32xf32>
    %374 = arith.addf %371, %373 : vector<2x32xf32>
    %cst_171 = arith.constant 0.000000e+00 : f32
    %375 = vector.broadcast %cst_171 : f32 to vector<2x32xf32>
    %376 = arith.maximumf %374, %375 : vector<2x32xf32>
    %cst_172 = arith.constant 0.000000e+00 : f32
    %377 = vector.broadcast %cst_172 : f32 to vector<1x32xf32>
    %378 = vector.extract_strided_slice %376 {offsets = [0, 0], sizes = [1, 32], strides = [1, 1]} : vector<2x32xf32> to vector<1x32xf32>
    %379 = arith.truncf %378 : vector<1x32xf32> to vector<1x32xbf16>
    %c0_173 = arith.constant 0 : index
    %c0_174 = arith.constant 0 : index
    %c0_175 = arith.constant 0 : index
    %380 = vector.load %arg13[%c0_173, %c0_174, %c0_175] : memref<2x32x32xbf16, #tpu.memory_space<vmem>>, vector<1x32x32xbf16>
    %381 = vector.shape_cast %380 : vector<1x32x32xbf16> to vector<32x32xbf16>
    %cst_176 = arith.constant dense<0.000000e+00> : vector<1x32xf32>
    %382 = tpu.matmul %379, %381, %cst_176 {dimension_numbers = #tpu.dot_dimension_numbers<[1], [0], [0], [1], [0, 0, 1, 1], [], []>} : vector<1x32xbf16>, vector<32x32xbf16>, vector<1x32xf32> -> vector<1x32xf32>
    %383 = arith.addf %377, %382 : vector<1x32xf32>
    %384 = vector.extract_strided_slice %376 {offsets = [1, 0], sizes = [1, 32], strides = [1, 1]} : vector<2x32xf32> to vector<1x32xf32>
    %385 = arith.truncf %384 : vector<1x32xf32> to vector<1x32xbf16>
    %c1_177 = arith.constant 1 : index
    %c0_178 = arith.constant 0 : index
    %c0_179 = arith.constant 0 : index
    %386 = vector.load %arg13[%c1_177, %c0_178, %c0_179] : memref<2x32x32xbf16, #tpu.memory_space<vmem>>, vector<1x32x32xbf16>
    %387 = vector.shape_cast %386 : vector<1x32x32xbf16> to vector<32x32xbf16>
    %cst_180 = arith.constant dense<0.000000e+00> : vector<1x32xf32>
    %388 = tpu.matmul %385, %387, %cst_180 {dimension_numbers = #tpu.dot_dimension_numbers<[1], [0], [0], [1], [0, 0, 1, 1], [], []>} : vector<1x32xbf16>, vector<32x32xbf16>, vector<1x32xf32> -> vector<1x32xf32>
    %389 = arith.addf %383, %388 : vector<1x32xf32>
    %c0_181 = arith.constant 0 : index
    %c0_182 = arith.constant 0 : index
    %390 = vector.load %arg14[%c0_181, %c0_182] : memref<1x32xf32, #tpu.memory_space<vmem>>, vector<1x32xf32>
    %391 = arith.addf %389, %390 : vector<1x32xf32>
    %cst_183 = arith.constant 0.000000e+00 : f32
    %392 = vector.broadcast %cst_183 : f32 to vector<1x32xf32>
    %393 = arith.maximumf %391, %392 : vector<1x32xf32>
    %c0_184 = arith.constant 0 : index
    %c0_185 = arith.constant 0 : index
    %c0_186 = arith.constant 0 : index
    %394 = vector.load %arg15[%c0_184, %c0_185, %c0_186] : memref<1x1x32xf32, #tpu.memory_space<vmem>>, vector<1x1x32xf32>
    %395 = vector.shape_cast %394 : vector<1x1x32xf32> to vector<1x32xf32>
    %396 = vector.shape_cast %393 : vector<1x32xf32> to vector<1x1x32xf32>
    tpu.vector_store %arg15[%c0_184, %c0_185, %c0_186], %396 {strides = array<i32>} : memref<1x1x32xf32, #tpu.memory_space<vmem>>, vector<1x1x32xf32>,
    return
  }
  func.func @transform_0(%arg0: i32) -> (i32, i32, i32) {
    %c0_i32 = arith.constant 0 : i32
    %c0_i32_0 = arith.constant 0 : i32
    %c0_i32_1 = arith.constant 0 : i32
    return %arg0, %c0_i32, %c0_i32_0 : i32, i32, i32
  }
  func.func @transform_1(%arg0: i32) -> (i32, i32) {
    %c0_i32 = arith.constant 0 : i32
    %c0_i32_0 = arith.constant 0 : i32
    %c0_i32_1 = arith.constant 0 : i32
    return %c0_i32, %c0_i32_0 : i32, i32
  }
  func.func @transform_2(%arg0: i32) -> (i32, i32, i32) {
    %c0_i32 = arith.constant 0 : i32
    %c0_i32_0 = arith.constant 0 : i32
    %c0_i32_1 = arith.constant 0 : i32
    %c0_i32_2 = arith.constant 0 : i32
    return %c0_i32, %c0_i32_0, %c0_i32_1 : i32, i32, i32
  }
  func.func @transform_3(%arg0: i32) -> (i32, i32) {
    %c0_i32 = arith.constant 0 : i32
    %c0_i32_0 = arith.constant 0 : i32
    %c0_i32_1 = arith.constant 0 : i32
    return %c0_i32, %c0_i32_0 : i32, i32
  }
  func.func @transform_4(%arg0: i32) -> (i32, i32, i32) {
    %c0_i32 = arith.constant 0 : i32
    %c0_i32_0 = arith.constant 0 : i32
    %c0_i32_1 = arith.constant 0 : i32
    %c0_i32_2 = arith.constant 0 : i32
    return %c0_i32, %c0_i32_0, %c0_i32_1 : i32, i32, i32
  }
  func.func @transform_5(%arg0: i32) -> (i32, i32) {
    %c0_i32 = arith.constant 0 : i32
    %c0_i32_0 = arith.constant 0 : i32
    %c0_i32_1 = arith.constant 0 : i32
    return %c0_i32, %c0_i32_0 : i32, i32
  }
  func.func @transform_6(%arg0: i32) -> (i32, i32, i32) {
    %c0_i32 = arith.constant 0 : i32
    %c0_i32_0 = arith.constant 0 : i32
    %c0_i32_1 = arith.constant 0 : i32
    %c0_i32_2 = arith.constant 0 : i32
    return %c0_i32, %c0_i32_0, %c0_i32_1 : i32, i32, i32
  }
  func.func @transform_7(%arg0: i32) -> (i32, i32) {
    %c0_i32 = arith.constant 0 : i32
    %c0_i32_0 = arith.constant 0 : i32
    %c0_i32_1 = arith.constant 0 : i32
    return %c0_i32, %c0_i32_0 : i32, i32
  }
  func.func @transform_8(%arg0: i32) -> (i32, i32, i32) {
    %c0_i32 = arith.constant 0 : i32
    %c0_i32_0 = arith.constant 0 : i32
    %c0_i32_1 = arith.constant 0 : i32
    %c0_i32_2 = arith.constant 0 : i32
    return %c0_i32, %c0_i32_0, %c0_i32_1 : i32, i32, i32
  }
  func.func @transform_9(%arg0: i32) -> (i32, i32) {
    %c0_i32 = arith.constant 0 : i32
    %c0_i32_0 = arith.constant 0 : i32
    %c0_i32_1 = arith.constant 0 : i32
    return %c0_i32, %c0_i32_0 : i32, i32
  }
  func.func @transform_10(%arg0: i32) -> (i32, i32, i32) {
    %c0_i32 = arith.constant 0 : i32
    %c0_i32_0 = arith.constant 0 : i32
    %c0_i32_1 = arith.constant 0 : i32
    %c0_i32_2 = arith.constant 0 : i32
    return %c0_i32, %c0_i32_0, %c0_i32_1 : i32, i32, i32
  }
  func.func @transform_11(%arg0: i32) -> (i32, i32) {
    %c0_i32 = arith.constant 0 : i32
    %c0_i32_0 = arith.constant 0 : i32
    %c0_i32_1 = arith.constant 0 : i32
    return %c0_i32, %c0_i32_0 : i32, i32
  }
  func.func @transform_12(%arg0: i32) -> (i32, i32, i32) {
    %c0_i32 = arith.constant 0 : i32
    %c0_i32_0 = arith.constant 0 : i32
    %c0_i32_1 = arith.constant 0 : i32
    %c0_i32_2 = arith.constant 0 : i32
    return %c0_i32, %c0_i32_0, %c0_i32_1 : i32, i32, i32
  }
  func.func @transform_13(%arg0: i32) -> (i32, i32) {
    %c0_i32 = arith.constant 0 : i32
    %c0_i32_0 = arith.constant 0 : i32
    %c0_i32_1 = arith.constant 0 : i32
    return %c0_i32, %c0_i32_0 : i32, i32
  }
  func.func @transform_14(%arg0: i32) -> (i32, i32, i32) {
    %c0_i32 = arith.constant 0 : i32
    %c0_i32_0 = arith.constant 0 : i32
    %c0_i32_1 = arith.constant 0 : i32
    return %arg0, %c0_i32, %c0_i32_0 : i32, i32, i32
  }
}

</mosaic_0001>

<bundles_post_ra>
// kernel: tpu_custom_call.1
= control target key start
LH: loop header
LB: loop body
LE: loop exit
PB: predicated region body
PF: predicated region fallthrough
CT: control target
= control target key end

     0   :  { %s5317_s0 = inlined_call_operand.vmem [shape: s32[2,16,1], index: 0, kind: input, shape index: {}]   ;;  %s5318_s1 = inlined_call_operand.vmem [shape: bf16[256,16], index: 1, kind: input, shape index: {}]   ;;  %s5319_s2 = inlined_call_operand.vmem [shape: bf16[7,16,32], index: 2, kind: input, shape index: {}]   ;;  %s5320_s3 = inlined_call_operand.hbm [shape: f32[1,32], index: 3, kind: input, shape index: {}]   ;;  %s5321_s4 = inlined_call_operand.hbm [shape: bf16[3,32,32], index: 4, kind: input, shape index: {}]   ;;  %s5322_s5 = inlined_call_operand.hbm [shape: f32[1,32], index: 5, kind: input, shape index: {}]   ;;  %s5323_s6 = inlined_call_operand.vmem [shape: bf16[7,32,32], index: 6, kind: input, shape index: {}]   ;;  %s5324_s7 = inlined_call_operand.vmem [shape: f32[1,32], index: 7, kind: input, shape index: {}]   ;;  %s5325_s8 = inlined_call_operand.hbm [shape: bf16[3,32,32], index: 8, kind: input, shape index: {}]   ;;  %s5326_s9 = inlined_call_operand.vmem [shape: f32[1,32], index: 9, kind: input, shape index: {}]   ;;  %s5327_s10 = inlined_call_operand.hbm [shape: bf16[3,32,32], index: 10, kind: input, shape index: {}]   ;;  %s5328_s11 = inlined_call_operand.vmem [shape: f32[1,32], index: 11, kind: input, shape index: {}]   ;;  %s5329_s12 = inlined_call_operand.vmem [shape: bf16[2,32,32], index: 12, kind: input, shape index: {}]   ;;  %s5330_s13 = inlined_call_operand.vmem [shape: f32[1,32], index: 13, kind: input, shape index: {}]   ;;  %s5331_s14 = inlined_call_operand.hbm [shape: f32[2,1,32], index: 14, kind: output, shape index: {}]  }
   0x1   :  { %5345 = sst [smem:[#allocation23_spill]] %s5328_s11 }
   0x2   :  { %5346 = sst [smem:[#allocation24_spill]] %s5330_s13 }
   0x3   :  { %5347 = sst [smem:[#allocation25_spill]] %s5331_s14 }
   0x4   :  { %19 = vsyncpa [#allocation3], 0 }
   0x5   :  { %20 = vsyncpa [#allocation6], 0 }
   0x6   :  { %21 = vsyncpa [#allocation9], 0 }
   0x7   :  { %22 = vsyncpa [#allocation4], 0 }
   0x8   :  { %24 = vsyncpa [#allocation4 + $0x1], 0  ;;  %s4600_s29 = smov 0   ;;  %s4602_s30 = smov 0  }
   0x9   :  { %s4604_s15 = smov 0   ;;  %s4606_s16 = smov 0  }
   0xa LB: > { %5348 = sst [smem:[#allocation16_spill]] %s4499_s29  ;;  %s4621_s17 = sadd.s32 4294967295, %s4511_s16   ;;  %s4511_s16 = sphi %s4606_s16, %s5377_s16   ;;  %s4507_s15 = sphi %s4604_s15, %s5382_s15   ;;  %s4503_s30 = sphi %s4602_s30, %s5381_s30   ;;  %s4499_s29 = sphi %s4600_s29, %s5380_s29  }
   0xb   : > { %5349 = sst [smem:[#allocation17_spill]] %s4507_s15  ;;  %s3484_s18 = sadd.s32 4294967294, %s4511_s16  }
   0xc   : > { %5350 = sst [smem:[#allocation18_spill]] %s4511_s16  ;;  %s4625_s19 = sadd.s32 1, %s4511_s16  }
   0xd   : > { %5351 = sst [smem:[#allocation19_spill]] %s4625_s19  ;;  %s336_s20 = sadd.s32 1, %s4507_s15 }
   0xe   : > { %s333_s21 = ssub.s32 %s4511_s16, %s4625_s19  ;;  %p346_p0 = scmp.ne.s32.totalorder %s4507_s15, %s4503_s30 }
   0xf   : > { %p334_p1 = scmp.eq.s32.totalorder %s333_s21, 0  ;;  %p347_p2 = scmp.eq.s32.totalorder %s4621_s17, 1 }
  0x10   : > { %p352_p3 = scmp.ne.s32.totalorder %s4503_s30, %s4499_s29  ;;  %p353_p4 = scmp.eq.s32.totalorder %s3484_s18, 1 }
  0x11   : > { %s4636_s22 = scalar_select %p334_p1, %s4507_s15, %s336_s20  }
  0x12   : > { %p4638_p5 = por %p347_p2, %p346_p0  ;;  %p4642_p6 = por %p353_p4, %p352_p3 }
  0x13   : > { %5352 = sst [smem:[#allocation20_spill]] %s4636_s22  ;;  %p3485_p7 = scmp.ge.s32.totalorder %s4511_s16, 1 }
  0x14   : > { %s5353_s23 = scalar_select %p4638_p5, 1, 0 }
  0x15   : > { %s5355_s24 = scalar_select %p4642_p6, 1, 0 }
  0x16   : > { %5354 = sst [smem:[#allocation21_spill]] %s5353_s23  ;;  %p360_p8 = scmp.lt.s32.totalorder %s4511_s16, 3 }
  0x17   : > { %5356 = sst [smem:[#allocation22_spill]] %s5355_s24  ;;  %p5338_p9 = scmp.eq.s32.totalorder %s4621_s17, 0 }
  0x18   : > { %p4649_p10 = pnand %p3485_p7, %p360_p8  ;;  %s4513_s26 = smov [#allocation5]  }
  0x19   : > { %s389_s27 = sshll.u32 %s4513_s26, 4  ;;  %s4514_s18 = smov [#allocation8]   ;;  %s4655_s27 = int_to_ptr.vmem [resolvable:$true] %s389_s27 }
  0x1a   : > { %s5357_s25 = scalar_select %p4649_p10, 1, 0 }
  0x1b   : > { %p4163_p11 = pneg %p4649_p10  ;;  %s419_s20 = sshll.u32 %s4514_s18, 4  ;;  %s4663_s20 = int_to_ptr.vmem [resolvable:$true] %s419_s20 }
  0x1c   : > { %s4515_s21 = smov [#allocation2]   ;;  %s4297_s26 = scalar_lea.hbm %s5321_s4, 768 }
  0x1d   : > { %p4659_p12 = pnand %p5338_p9, %p4163_p11  ;;  %s4665_s22 = sshll.u32 %s4515_s21, 4  ;;  %s380_s22 = int_to_ptr.vmem [resolvable:$true] %s4665_s22 }
  0x1e   : > { %p4298_p13 = scmp.ne.s32.totalorder %s5321_s4, %s4297_s26  ;;  %p4304_p3 = scmp.lt.u32.totalorder %s4297_s26, %s5321_s4 }
  0x1f   : > { %p4675_p0 = pneg %p4659_p12 }
  0x21   : > { %p4300_p1 = pnand %p4675_p0, %p4298_p13 }
  0x23   : > { %p4301_p2 = pneg %p4300_p1 }
  0x25   : > { %p4306_p4 = pnand %p4304_p3, %p4301_p2 }
  0x27   : > { %4309 = shalt.err (!%p4306_p4)
}
  0x28   : > { %s4310_s29 = scalar_lea.vmem %s4655_s27, 768  ;;  %p4318_p9 = scmp.lt.s32.totalorder %s4655_s27, %s4655_s27 }
  0x29   : > { %p4311_p7 = scmp.ne.s32.totalorder %s4655_s27, %s4310_s29  ;;  %p4319_p6 = scmp.lt.s32.totalorder %s4310_s29, %s4310_s29 }
  0x2b   : > { %p4313_p8 = pnand %p4311_p7, %p4675_p0  ;;  %p4320_p13 = por %p4319_p6, %p4318_p9 }
  0x2d   : > { %p4314_p11 = pneg %p4313_p8 }
  0x2f   : > { %p4321_p1 = pnand %p4320_p13, %p4314_p11 }
  0x31   : > { %4324 = shalt.err (!%p4321_p1)
}
  0x32   : > { %s5344_s15 = smov 64   ;;  %s4517_s19 = smov 4  }
  0x33   : > { %4169 = dma.hbm_to_vmem [thread:$0]  (!%p4659_p12), %s5321_s4, 768, %s4655_s27, [#allocation6], %s5344_s15, %s5344_s15, %s4517_s19  }
  0x34   : > { %s4325_s29 = scalar_lea.hbm %s5325_s8, 768 }
  0x35   : > { %p4326_p6 = scmp.ne.s32.totalorder %s5325_s8, %s4325_s29  ;;  %p4332_p3 = scmp.lt.u32.totalorder %s4325_s29, %s5325_s8 }
  0x37   : > { %p4328_p9 = pnand %p4326_p6, %p4675_p0 }
  0x39   : > { %p4329_p2 = pneg %p4328_p9 }
  0x3b   : > { %p4334_p4 = pnand %p4332_p3, %p4329_p2 }
  0x3d   : > { %4337 = shalt.err (!%p4334_p4)
}
  0x3e   : > { %s4338_s27 = scalar_lea.vmem %s4663_s20, 768  ;;  %p4346_p13 = scmp.lt.s32.totalorder %s4663_s20, %s4663_s20 }
  0x3f   : > { %p4339_p7 = scmp.ne.s32.totalorder %s4663_s20, %s4338_s27  ;;  %p4347_p1 = scmp.lt.s32.totalorder %s4338_s27, %s4338_s27 }
  0x41   : > { %p4341_p8 = pnand %p4339_p7, %p4675_p0  ;;  %p4348_p6 = por %p4347_p1, %p4346_p13 }
  0x43   : > { %p4342_p11 = pneg %p4341_p8 }
  0x45   : > { %p4349_p9 = pnand %p4348_p6, %p4342_p11 }
  0x47   : > { %4352 = shalt.err (!%p4349_p9)
}
  0x48   : > { %4175 = dma.hbm_to_vmem [thread:$0]  (!%p4659_p12), %s5325_s8, 768, %s4663_s20, [#allocation9], %s5344_s15, %s5344_s15, %s4517_s19  }
  0x49   : > { %s4353_s24 = scalar_lea.hbm %s5320_s3, 16 }
  0x4a   : > { %p4354_p2 = scmp.ne.s32.totalorder %s5320_s3, %s4353_s24  ;;  %p4360_p7 = scmp.lt.u32.totalorder %s4353_s24, %s5320_s3 }
  0x4c   : > { %p4356_p3 = pnand %p4354_p2, %p4675_p0 }
  0x4e   : > { %p4357_p4 = pneg %p4356_p3 }
  0x50   : > { %p4362_p8 = pnand %p4360_p7, %p4357_p4 }
  0x52   : > { %4365 = shalt.err (!%p4362_p8)
}
  0x53   : > { %s4366_s27 = scalar_lea.vmem %s380_s22, 16  ;;  %s4373_s20 = scalar_lea.vmem %s380_s22, 32 }
  0x54   : > { %p4367_p11 = scmp.ne.s32.totalorder %s380_s22, %s4366_s27  ;;  %p4374_p6 = scmp.lt.s32.totalorder %s380_s22, %s380_s22 }
  0x55   : > { %p4375_p9 = scmp.lt.s32.totalorder %s4373_s20, %s4366_s27 }
  0x56   : > { %p4369_p13 = pnand %p4367_p11, %p4675_p0 }
  0x57   : > { %p4376_p5 = por %p4375_p9, %p4374_p6 }
  0x58   : > { %p4370_p1 = pneg %p4369_p13 }
  0x5a   : > { %p4377_p10 = pnand %p4376_p5, %p4370_p1 }
  0x5c   : > { %4380 = shalt.err (!%p4377_p10)
}
  0x5d   : > { %4166 = dma.hbm_to_vmem [thread:$0]  (!%p4659_p12), %s5320_s3, 16, %s380_s22, [#allocation3]  }
  0x5e   : > { %s4518_s14 = smov [#allocation7]   ;;  %s4519_s24 = smov [#allocation10]  }
  0x5f   : > { %s403_s23 = sshll.u32 %s4518_s14, 4  ;;  %s435_s26 = sshll.u32 %s4519_s24, 4  ;;  %s404_s23 = int_to_ptr.vmem [resolvable:$true] %s403_s23  ;;  %s436_s26 = int_to_ptr.vmem [resolvable:$true] %s435_s26 }
  0x60   : > { %s4381_s29 = scalar_lea.hbm %s5322_s5, 16 }
  0x61   : > { %p4382_p5 = scmp.ne.s32.totalorder %s5322_s5, %s4381_s29  ;;  %p4388_p3 = scmp.lt.u32.totalorder %s4381_s29, %s5322_s5 }
  0x63   : > { %p4384_p10 = pnand %p4382_p5, %p4675_p0 }
  0x65   : > { %p4385_p2 = pneg %p4384_p10 }
  0x67   : > { %p4390_p4 = pnand %p4388_p3, %p4385_p2 }
  0x69   : > { %4393 = shalt.err (!%p4390_p4)
}
  0x6a   : > { %s4394_s22 = scalar_lea.vmem %s404_s23, 16  ;;  %s4401_s13 = scalar_lea.vmem %s404_s23, 32 }
  0x6b   : > { %p4395_p7 = scmp.ne.s32.totalorder %s404_s23, %s4394_s22  ;;  %p4402_p13 = scmp.lt.s32.totalorder %s404_s23, %s404_s23 }
  0x6c   : > { %p4403_p1 = scmp.lt.s32.totalorder %s4401_s13, %s4394_s22 }
  0x6d   : > { %p4397_p8 = pnand %p4395_p7, %p4675_p0 }
  0x6e   : > { %p4404_p6 = por %p4403_p1, %p4402_p13 }
  0x6f   : > { %p4398_p11 = pneg %p4397_p8 }
  0x71   : > { %p4405_p9 = pnand %p4404_p6, %p4398_p11 }
  0x73   : > { %4408 = shalt.err (!%p4405_p9)
}
  0x74   : > { %4172 = dma.hbm_to_vmem [thread:$0]  (!%p4659_p12), %s5322_s5, 16, %s404_s23, [#allocation6]  }
  0x75   : > { %s4409_s21 = scalar_lea.hbm %s5327_s10, 768 }
  0x76   : > { %p4410_p5 = scmp.ne.s32.totalorder %s5327_s10, %s4409_s21  ;;  %p4416_p3 = scmp.lt.u32.totalorder %s4409_s21, %s5327_s10 }
  0x78   : > { %p4412_p10 = pnand %p4410_p5, %p4675_p0 }
  0x7a   : > { %p4413_p2 = pneg %p4412_p10 }
  0x7c   : > { %p4418_p4 = pnand %p4416_p3, %p4413_p2 }
  0x7e   : > { %4421 = shalt.err (!%p4418_p4)
}
  0x7f   : > { %s4422_s22 = scalar_lea.vmem %s436_s26, 768  ;;  %p4430_p13 = scmp.lt.s32.totalorder %s436_s26, %s436_s26 }
  0x80   : > { %p4423_p7 = scmp.ne.s32.totalorder %s436_s26, %s4422_s22  ;;  %p4431_p1 = scmp.lt.s32.totalorder %s4422_s22, %s4422_s22 }
  0x82   : > { %p4425_p8 = pnand %p4423_p7, %p4675_p0  ;;  %p4432_p6 = por %p4431_p1, %p4430_p13 }
  0x84   : > { %p4426_p11 = pneg %p4425_p8 }
  0x86   : > { %p4433_p9 = pnand %p4432_p6, %p4426_p11 }
  0x88   : > { %4436 = shalt.err (!%p4433_p9)
}
  0x89   : > { %s5360_s23 = smov 64   ;;  %p5361_p5 = scmp.ne.s32.totalorder %s5357_s25, 0 }
  0x8a   : > { %4178 = dma.hbm_to_vmem [thread:$0]  (!%p4659_p12), %s5327_s10, 768, %s436_s26, [#allocation9], %s5360_s23, %s5360_s23, %s4517_s19  }
  0x8b   : > { %468 = sbr.rel (%p5361_p5) target bundleno = 4133 (0x1025), region = 76  ;;  %p5362_p0 = scmp.eq.s32.totalorder (!%p5361_p5), %s4621_s17, 0 }
  0x92   : > { %4482 = dma.done.wait (%p5362_p0), [#allocation3], 16   ;;  %p5363_p10 = pmov %p5362_p0 }
  0x93   : > { %p5364_p2 = pmov %p5362_p0 }
  0x94   : > { %4484 = vsyncadd (%p5363_p10), [#allocation3], 4294967280 }
  0x95   : > { %4486 = dma.done.wait (%p5364_p2), [#allocation6], 784   ;;  %p5365_p3 = pmov %p5362_p0 }
  0x96   : > { %p5366_p4 = pmov %p5362_p0 }
  0x97   : > { %4488 = vsyncadd (%p5365_p3), [#allocation6], 4294966512 }
  0x98   : > { %4490 = dma.done.wait (%p5366_p4), [#allocation9], 1536   ;;  %p5367_p12 = pmov %p5362_p0 }
  0x99   : > { %p529_p7 = scmp.lt.s32.totalorder %s4621_s17, 1  ;;  %v4520_v0 = vmov 0   ;;  %v4238_v3 = vld [vmem:[%s5318_s1 + $0x40] sm:$0xff]   ;;  %v4240_v5 = vld [vmem:[%s5318_s1 + $0x48] sm:$0xff]   ;;  %v4242_v7 = vld [vmem:[%s5318_s1 + $0x50] sm:$0xff]   ;;  %v537_v19 = vlaneseq  ;;  %v4522_v25 = vmov 0.0  }
  0x9a   : > { %4492 = vsyncadd (%p5367_p12), [#allocation9], 4294965760  ;;  %4237 = vset.pattern.permute.xlu0 %v4520_v0  ;;  %v4239_v4 = vld [vmem:[%s5318_s1] sm:$0xff]   ;;  %3681 = vmatprep.subr.bf16.mxu0 %v4238_v3  ;;  %v4241_v6 = vld [vmem:[%s5318_s1 + $0x8] sm:$0xff]   ;;  %v4521_v24 = vmov 1.0|1.0  }
  0x9b   : > { %s530_s16 = scalar_select %p529_p7, %s4621_s17, 1  ;;  %3682 = vmatpush3.bf16.msra.mxu0 %v4239_v4  ;;  %v4243_v8 = vld [vmem:[%s5318_s1 + $0x10] sm:$0xff]   ;;  %v4244_v9 = vld [vmem:[%s5318_s1 + $0x58] sm:$0xff]   ;;  %v4246_v11 = vld [vmem:[%s5318_s1 + $0x60] sm:$0xff]   ;;  %v4850_v20 = vand.u32 127, %v537_v19  ;;  %3817 = vmatprep.subr.bf16.mxu1 %v4522_v25  ;;  %vm4523_vm6 = vmmov 0  }
  0x9c   : > { %3683 = vmatprep.subr.bf16.mxu0 %v4240_v5  ;;  %v4245_v10 = vld [vmem:[%s5318_s1 + $0x18] sm:$0xff]   ;;  %v4247_v12 = vld [vmem:[%s5318_s1 + $0x20] sm:$0xff]   ;;  %v4248_v13 = vld [vmem:[%s5318_s1 + $0x68] sm:$0xff]   ;;  %3819 = vmatprep.mubr.msk.bf16.mxu1 %vm4523_vm6, %v4522_v25  ;;  %v4861_v26 = vshrl.u32 %v537_v19, 7  ;;  %vm742_vm9 = vcmask 130048   ;;  %s5368_s21 = sld [smem:[#allocation23_spill]] }
  0x9d   : > { %s3680_s25 = sshll.u32 %s530_s16, 4  ;;  %v4249_v14 = vld [vmem:[%s5318_s1 + $0x28] sm:$0xff]   ;;  %v4250_v15 = vld [vmem:[%s5318_s1 + $0x70] sm:$0xff]   ;;  %v4252_v17 = vld [vmem:[%s5318_s1 + $0x78] sm:$0xff]   ;;  %v539_v22 = vadd.s32 128, %v4850_v20  ;;  %s527_s29 = sand.u32 1, %s4503_s30  }
  0x9e   : > { %s533_s26 = scalar_lea.vmem %s5317_s0, %s3680_s25  ;;  %v4251_v16 = vld [vmem:[%s5318_s1 + $0x30] sm:$0xff]   ;;  %v4253_v18 = vld [vmem:[%s5318_s1 + $0x38] sm:$0xff]   ;;  %v4864_v27 = vadd.s32 8, %v4861_v26  ;;  %v733_v28 = vadd.s32 4294967293, %v4861_v26  ;;  %v790_v38 = vadd.s32 4294967294, %v4861_v26  ;;  %v4254_v45 = vld [vmem:[%s5319_s2 + $0x8] sm:$0xff]   ;;  %vm1056_vm14 = vcmp.eq.s32.totalorder %v4850_v20, %v4861_v26 }
  0x9f   : > { %v535_v1 = vld [vmem:[%s533_s26] sm:$0xff]  ;;  %v536_v2 = vld [vmem:[%s533_s26 + $0x8] sm:$0xff]  ;;  %3684 = vmatpush3.bf16.msra.mxu0 %v4241_v6  ;;  %v947_v57 = vadd.s32 4294967295, %v4861_v26  ;;  %v4930_v62 = vsel %vm1056_vm14, 1.0, %v4522_v25  ;;  %v1163_v0 = vadd.s32 1, %v4861_v26  ;;  %v1272_v5 = vadd.s32 2, %v4861_v26 }
  0xa0   : > { %541 = vperm.xlu0 %4237, %v535_v1   ;;  %3685 = vmatprep.subr.bf16.mxu0 %v4242_v7  ;;  %v734_v29 = vadd.s32 4294967293, %v4864_v27  ;;  %vm735_vm7 = vcmp.eq.s32.totalorder %v4850_v20, %v733_v28  ;;  %v791_v39 = vadd.s32 4294967294, %v4864_v27  ;;  %vm792_vm10 = vcmp.eq.s32.totalorder %v4850_v20, %v790_v38  ;;  %v4255_v54 = vld [vmem:[%s5319_s2] sm:$0xff]   ;;  %s5369_s11 = sld [smem:[#allocation24_spill]]  ;;  %s5370_s22 = sld [smem:[#allocation21_spill]] }
  0xa1   : > { %v4871_v36 = vsel %vm735_vm7, 1.0, %v4522_v25  ;;  %v4888_v42 = vsel %vm792_vm10, 1.0, %v4522_v25  ;;  %v948_v58 = vadd.s32 4294967295, %v4864_v27  ;;  %vm949_vm12 = vcmp.eq.s32.totalorder %v4850_v20, %v947_v57  ;;  %s3677_s23 = sshll.u32 %s4621_s17, 4  ;;  %s528_s13 = scalar_lea.vmem [#allocation11], %s527_s29 }
  0xa2   : > { %vm736_vm8 = vcmp.eq.s32.totalorder %v4850_v20, %v734_v29  ;;  %vm793_vm11 = vcmp.eq.s32.totalorder %v4850_v20, %v791_v39  ;;  %v4916_v59 = vsel %vm949_vm12, 1.0, %v4522_v25  ;;  %vm1057_vm15 = vcmp.eq.s32.totalorder %v4850_v20, %v4864_v27  ;;  %s3379_s14 = sshll.u32 %s528_s13, 4  ;;  %s5371_s28 = sld [smem:[#allocation25_spill]]  ;;  %s5277_s14 = int_to_ptr.vmem [resolvable:$true] %s3379_s14 }
  0xa3   : > { %3686 = vmatpush3.bf16.msra.mxu0 %v4243_v8  ;;  %v3525_v37 = vsel %vm736_vm8, 1.0, %v4522_v25  ;;  %v3528_v43 = vsel %vm793_vm11, 1.0, %v4522_v25  ;;  %vm950_vm13 = vcmp.eq.s32.totalorder %v4850_v20, %v948_v58  ;;  %v3544_v63 = vsel %vm1057_vm15, 1.0, %v4522_v25  ;;  %s3367_s26 = scalar_lea.sflag [#allocation4], %s527_s29  ;;  %s4437_s24 = scalar_lea.vmem %s5277_s14, 16 }
  0xa4   : > { %544 = vperm.xlu0 %4237, %v536_v2   ;;  %3687 = vmatprep.subr.bf16.mxu0 %v4244_v9  ;;  %v741_v41 = vpack.c.bf16 %v3525_v37, %v4871_v36  ;;  %v798_v44 = vpack.c.bf16 %v3528_v43, %v4888_v42  ;;  %v3537_v60 = vsel %vm950_vm13, 1.0, %v4522_v25  ;;  %v1164_v1 = vadd.s32 1, %v4864_v27  ;;  %p4438_p8 = scmp.ne.s32.totalorder %s5277_s14, %s4437_s24  ;;  %s4524_s17 = smov [#allocation11]  }
  0xa5   : > { %v955_v61 = vpack.c.bf16 %v3537_v60, %v4916_v59  ;;  %v1062_v2 = vpack.c.bf16 %v3544_v63, %v4930_v62  ;;  %v1273_v6 = vadd.s32 2, %v4864_v27  ;;  %vm1621_vm10 = vcmask 261120   ;;  %s4441_s15 = sshll.u32 %s4524_s17, 4  ;;  %s4442_s15 = int_to_ptr.vmem [resolvable:$false] %s4441_s15 }
  0xa6   : > { %vm1841_vm12 = vcmask 64512   ;;  %vm2919_vm13 = vcmask 1041408   ;;  %vm2916_vm14 = vcmask 31744   ;;  %p5372_p11 = scmp.ne.s32.totalorder %s5370_s22, 0  ;;  %s4443_s18 = scalar_lea.vmem %s4442_s15, 32 }
  0xa7   : > { %3688 = vmatpush3.bf16.msra.mxu0 %v4245_v10  ;;  %v1381_v10 = vadd.s32 3, %v4861_v26  ;;  %p4444_p6 = scmp.lt.s32.totalorder %s5277_s14, %s4442_s15  ;;  %p4445_p9 = scmp.lt.s32.totalorder %s4443_s18, %s4437_s24 }
  0xa8   : > { %3689 = vmatprep.subr.bf16.mxu0 %v4246_v11  ;;  %v1382_v11 = vadd.s32 3, %v4864_v27  ;;  %s5275_s19 = scalar_lea.hbm %s5371_s28, %s3677_s23  ;;  %p4439_p13 = pnand %p4438_p8, %p5372_p11 }
  0xa9   : > { %p4446_p5 = por %p4445_p9, %p4444_p6 }
  0xaa   : > { %p4440_p1 = pneg %p4439_p13 }
  0xab   : > { %3690 = vmatpush3.bf16.msra.mxu0 %v4247_v12 }
  0xac   : > { %3691 = vmatprep.subr.bf16.mxu0 %v4248_v13  ;;  %p4447_p0 = pnand %p4446_p5, %p4440_p1 }
  0xaf   : > { %3692 = vmatpush3.bf16.msra.mxu0 %v4249_v14 }
  0xb0   : > { %3693 = vmatprep.subr.bf16.mxu0 %v4250_v15 }
  0xb3   : > { %3694 = vmatpush3.bf16.msra.mxu0 %v4251_v16  ;;  %v4256_v16 = vld [vmem:[%s5319_s2 + $0x10] sm:$0xff]  }
  0xb4   : > { %3695 = vmatprep.subr.bf16.mxu0 %v4252_v17 }
  0xb7   : > { %3696 = vmatpush3.bf16.msra.mxu0 %v4253_v18 }
  0xb8   : > { %3847 = vmatprep.subr.bf16.mxu0 %v4522_v25 }
 0x11f   : > { %v542_v21 = vpop.permute.xlu0 %541 }
 0x120   : > { %vm546_vm0 = vcmp.eq.s32.totalorder %v4850_v20, %v542_v21  ;;  %vm547_vm4 = vcmp.eq.s32.totalorder %v539_v22, %v542_v21 }
 0x123   : > { %v545_v23 = vpop.permute.xlu0 %544 }
 0x124   : > { %vm548_vm1 = vcmp.eq.s32.totalorder %v4850_v20, %v545_v23  ;;  %vm549_vm2 = vcmp.eq.s32.totalorder %v539_v22, %v545_v23 }
 0x125   : > { %vm3522_vm3 = vmpackc.low %vm548_vm1, %vm546_vm0  ;;  %vm1165_vm0 = vcmp.eq.s32.totalorder %v4850_v20, %v1163_v0  ;;  %vm1166_vm1 = vcmp.eq.s32.totalorder %v4850_v20, %v1164_v1 }
 0x126   : > { %vm3520_vm5 = vmpackc.low %vm549_vm2, %vm547_vm4  ;;  %v4944_v3 = vsel %vm1165_vm0, 1.0, %v4522_v25  ;;  %v3551_v4 = vsel %vm1166_vm1, 1.0, %v4522_v25  ;;  %vm1274_vm2 = vcmp.eq.s32.totalorder %v4850_v20, %v1272_v5  ;;  %vm1383_vm4 = vcmp.eq.s32.totalorder %v4850_v20, %v1381_v10 }
 0x127   : > { %3521 = vmatprep.mubr.msk.bf16.mxu0 %vm3520_vm5, %v4521_v24  ;;  %v1171_v7 = vpack.c.bf16 %v3551_v4, %v4944_v3  ;;  %v4958_v8 = vsel %vm1274_vm2, 1.0, %v4522_v25  ;;  %vm1384_vm5 = vcmp.eq.s32.totalorder %v4850_v20, %v1382_v11  ;;  %v4972_v13 = vsel %vm1383_vm4, 1.0, %v4522_v25 }
 0x128   : > { %3523 = vmatmul.mubr.msk.bf16.vlgmr.msra.gmra.mrb[0].mxu0 %vm3522_vm3, %v4521_v24  ;;  %vm1275_vm3 = vcmp.eq.s32.totalorder %v4850_v20, %v1273_v6  ;;  %v3565_v14 = vsel %vm1384_vm5, 1.0, %v4522_v25 }
 0x129   : > { %3849 = vmatprep.mubr.msk.bf16.mxu0 %vm4523_vm6, %v4522_v25  ;;  %v3558_v9 = vsel %vm1275_vm3, 1.0, %v4522_v25  ;;  %v1389_v15 = vpack.c.bf16 %v3565_v14, %v4972_v13  ;;  %3848 = vmatpush3.bf16.msra.mxu0 %v4256_v16 }
 0x12a   : > { %v1280_v12 = vpack.c.bf16 %v3558_v9, %v4958_v8  ;;  %3859 = vmatprep.subr.bf16.mxu0 %v4522_v25 }
 0x1fb   : > { %v3697_v30 = vpop.f32.mrb[0].mxu0 }
 0x1fc   : > { %v3698_v31 = vpop.f32.mrb[1].mxu0 }
 0x1fd   : > { %v3699_v32 = vadd.f32 %v3698_v31, %v3697_v30  ;;  %v3700_v33 = vpop.f32.mrb[2].mxu0 }
 0x1fe   : > { %v3701_v34 = vpop.f32.mrb[3].mxu0 }
 0x1ff   : > { %v3702_v35 = vadd.f32 %v3701_v34, %v3700_v33  ;;  %v4257_v33 = vld [vmem:[%s5319_s2 + $0x18] sm:$0xff]  }
 0x201   : > { %v4876_v40 = vpack.c.bf16 %v3702_v35, %v3699_v32 }
 0x203   : > { %3818 = vmatpush3.bf16.msra.mxu1 %v4876_v40 }
 0x204   : > { %3823 = vmatprep.subr.bf16.mxu1 %v4522_v25 }
 0x206   : > { %3820 = vmatmul.mubr.msk.bf16.vlgmr.msra.gmra.mrb[0].mxu1 %vm742_vm9, %v741_v41 }
 0x207   : > { %3824 = vmatpush3.bf16.msra.mxu1 %v4876_v40  ;;  %3825 = vmatprep.mubr.msk.bf16.mxu1 %vm4523_vm6, %v4522_v25 }
 0x208   : > { %3829 = vmatprep.subr.bf16.mxu1 %v4522_v25 }
 0x20e   : > { %3826 = vmatmul.mubr.msk.bf16.vlgmr.msra.gmra.mrb[4].mxu1 %vm742_vm9, %v798_v44 }
 0x20f   : > { %3831 = vmatprep.mubr.msk.bf16.mxu1 %vm4523_vm6, %v4522_v25  ;;  %3830 = vmatpush3.bf16.msra.mxu1 %v4254_v45 }
 0x210   : > { %3835 = vmatprep.subr.bf16.mxu1 %v4522_v25 }
 0x2d9   : > { %v780_v46 = vpop.f32.mrb[0].mxu1 }
 0x2da   : > { %v3821_v47 = vpop.f32.mrb[1].mxu1 }
 0x2db   : > { %v783_v48 = vpop.f32.mrb[2].mxu1  ;;  %v4259_v47 = vld [vmem:[%s5319_s2 + $0x28] sm:$0xff]  }
 0x2dc   : > { %v787_v49 = vpack.c.bf16 %v783_v48, %v780_v46  ;;  %v3822_v50 = vpop.f32.mrb[3].mxu1 }
 0x2e1   : > { %v836_v51 = vpop.f32.mrb[4].mxu1 }
 0x2e2   : > { %v3827_v52 = vpop.f32.mrb[5].mxu1 }
 0x2e3   : > { %v839_v53 = vpop.f32.mrb[6].mxu1 }
 0x2e4   : > { %v843_v55 = vpack.c.bf16 %v839_v53, %v836_v51  ;;  %v3828_v56 = vpop.f32.mrb[7].mxu1  ;;  %v4260_v53 = vld [vmem:[%s5319_s2 + $0x30] sm:$0xff]  }
 0x2e6   : > { %3832 = vmatmul.mubr.msk.bf16.vlgmr.msra.gmra.mrb[8].mxu1 %vm742_vm9, %v843_v55 }
 0x2e7   : > { %3836 = vmatpush3.bf16.msra.mxu1 %v4255_v54  ;;  %3837 = vmatprep.mubr.msk.bf16.mxu1 %vm4523_vm6, %v4522_v25 }
 0x2e8   : > { %3841 = vmatprep.subr.bf16.mxu1 %v4522_v25 }
 0x2ee   : > { %3838 = vmatmul.mubr.msk.bf16.vlgmr.msra.gmra.mrb[12].mxu1 %vm742_vm9, %v787_v49 }
 0x2ef   : > { %3842 = vmatpush3.bf16.msra.mxu1 %v4876_v40  ;;  %3843 = vmatprep.mubr.msk.bf16.mxu1 %vm4523_vm6, %v4522_v25 }
 0x2f0   : > { %3853 = vmatprep.subr.bf16.mxu1 %v4522_v25 }
 0x2f6   : > { %3844 = vmatmul.mubr.msk.bf16.vlgmr.msra.gmra.mrb[16].mxu1 %vm742_vm9, %v955_v61 }
 0x2f7   : > { %3854 = vmatpush3.bf16.msra.mxu1 %v4876_v40  ;;  %3855 = vmatprep.mubr.msk.bf16.mxu1 %vm4523_vm6, %v4522_v25 }
 0x2f8   : > { %3865 = vmatprep.subr.bf16.mxu1 %v4522_v25 }
 0x2fe   : > { %3856 = vmatmul.mubr.msk.bf16.vlgmr.msra.gmra.mrb[20].mxu1 %vm742_vm9, %v1062_v2 }
 0x2ff   : > { %3866 = vmatpush3.bf16.msra.mxu1 %v4876_v40  ;;  %3867 = vmatprep.mubr.msk.bf16.mxu1 %vm4523_vm6, %v4522_v25 }
 0x300   : > { %3877 = vmatprep.subr.bf16.mxu1 %v4522_v25 }
 0x306   : > { %3868 = vmatmul.mubr.msk.bf16.vlgmr.msra.gmra.mrb[24].mxu1 %vm742_vm9, %v1171_v7 }
 0x307   : > { %3878 = vmatpush3.bf16.msra.mxu1 %v4876_v40  ;;  %3879 = vmatprep.mubr.msk.bf16.mxu1 %vm4523_vm6, %v4522_v25 }
 0x308   : > { %3889 = vmatprep.subr.bf16.mxu1 %v4522_v25 }
 0x30e   : > { %3880 = vmatmul.mubr.msk.bf16.vlgmr.msra.gmra.mrb[28].mxu1 %vm742_vm9, %v1280_v12 }
 0x30f   : > { %3890 = vmatpush3.bf16.msra.mxu1 %v4876_v40  ;;  %3891 = vmatprep.mubr.msk.bf16.mxu1 %vm4523_vm6, %v4522_v25  ;;  %v4258_v40 = vld [vmem:[%s5319_s2 + $0x20] sm:$0xff]  }
 0x310   : > { %3901 = vmatprep.subr.bf16.mxu1 %v4522_v25 }
 0x316   : > { %3892 = vmatmul.mubr.msk.bf16.vlgmr.msra.gmra.mrb[32].mxu1 %vm742_vm9, %v1389_v15 }
 0x317   : > { %3903 = vmatprep.mubr.msk.bf16.mxu1 %vm4523_vm6, %v4522_v25 }
 0x3b9   : > { %v890_v17 = vpop.f32.mrb[8].mxu1 }
 0x3ba   : > { %v3833_v18 = vpop.f32.mrb[9].mxu1 }
 0x3bb   : > { %v893_v19 = vpop.f32.mrb[10].mxu1 }
 0x3bc   : > { %v3834_v21 = vpop.f32.mrb[11].mxu1 }
 0x3c1   : > { %v940_v22 = vpop.f32.mrb[12].mxu1 }
 0x3c2   : > { %v941_v23 = vadd.f32 %v940_v22, %v890_v17  ;;  %v3839_v24 = vpop.f32.mrb[13].mxu1 }
 0x3c3   : > { %v943_v27 = vpop.f32.mrb[14].mxu1 }
 0x3c4   : > { %v944_v28 = vadd.f32 %v943_v27, %v893_v19  ;;  %v3840_v29 = vpop.f32.mrb[15].mxu1 }
 0x3c9   : > { %v993_v30 = vpop.f32.mrb[16].mxu1 }
 0x3ca   : > { %v3845_v31 = vpop.f32.mrb[17].mxu1 }
 0x3cb   : > { %v996_v32 = vpop.f32.mrb[18].mxu1  ;;  %v3571_v31 = vld [vmem:[#allocation2] ss:$0 sm:$0xff] }
 0x3cc   : > { %v1000_v34 = vpack.c.bf16 %v996_v32, %v993_v30  ;;  %v3846_v35 = vpop.f32.mrb[19].mxu1 }
 0x3ce   : > { %3850 = vmatmul.mubr.msk.bf16.vlgmr.msra.gmra.mrb[4].mxu0 %vm742_vm9, %v1000_v34 }
 0x3cf   : > { %3860 = vmatpush3.bf16.msra.mxu0 %v4257_v33  ;;  %3861 = vmatprep.mubr.msk.bf16.mxu0 %vm4523_vm6, %v4522_v25 }
 0x3d0   : > { %3871 = vmatprep.subr.bf16.mxu0 %v4522_v25 }
 0x3d1   : > { %v1100_v37 = vpop.f32.mrb[20].mxu1 }
 0x3d2   : > { %v3857_v38 = vpop.f32.mrb[21].mxu1 }
 0x3d3   : > { %v1103_v39 = vpop.f32.mrb[22].mxu1 }
 0x3d4   : > { %v1107_v41 = vpack.c.bf16 %v1103_v39, %v1100_v37  ;;  %v3858_v43 = vpop.f32.mrb[23].mxu1 }
 0x3d6   : > { %3862 = vmatmul.mubr.msk.bf16.vlgmr.msra.gmra.mrb[8].mxu0 %vm742_vm9, %v1107_v41 }
 0x3d7   : > { %3872 = vmatpush3.bf16.msra.mxu0 %v4258_v40  ;;  %3873 = vmatprep.mubr.msk.bf16.mxu0 %vm4523_vm6, %v4522_v25 }
 0x3d8   : > { %3883 = vmatprep.subr.bf16.mxu0 %v4522_v25 }
 0x3d9   : > { %v1209_v44 = vpop.f32.mrb[24].mxu1 }
 0x3da   : > { %v3869_v45 = vpop.f32.mrb[25].mxu1 }
 0x3db   : > { %v1212_v46 = vpop.f32.mrb[26].mxu1 }
 0x3dc   : > { %v1216_v48 = vpack.c.bf16 %v1212_v46, %v1209_v44  ;;  %v3870_v49 = vpop.f32.mrb[27].mxu1 }
 0x3dd   : > { %v4262_v49 = vld [vmem:[#allocation5] sm:$0xff]  }
 0x3de   : > { %3874 = vmatmul.mubr.msk.bf16.vlgmr.msra.gmra.mrb[12].mxu0 %vm742_vm9, %v1216_v48  ;;  %v4261_v48 = vld [vmem:[#allocation5 + $0x10] sm:$0xff]  }
 0x3df   : > { %3884 = vmatpush3.bf16.msra.mxu0 %v4259_v47  ;;  %3885 = vmatprep.mubr.msk.bf16.mxu0 %vm4523_vm6, %v4522_v25 }
 0x3e0   : > { %3895 = vmatprep.subr.bf16.mxu0 %v4522_v25 }
 0x3e1   : > { %v1318_v50 = vpop.f32.mrb[28].mxu1 }
 0x3e2   : > { %v3881_v51 = vpop.f32.mrb[29].mxu1 }
 0x3e3   : > { %v1321_v52 = vpop.f32.mrb[30].mxu1  ;;  %v4264_v51 = vld [vmem:[#allocation5 + $0x8] sm:$0xff]  }
 0x3e4   : > { %v1325_v54 = vpack.c.bf16 %v1321_v52, %v1318_v50  ;;  %v3882_v55 = vpop.f32.mrb[31].mxu1  ;;  %v4263_v50 = vld [vmem:[#allocation5 + $0x18] sm:$0xff]  }
 0x3e6   : > { %3886 = vmatmul.mubr.msk.bf16.vlgmr.msra.gmra.mrb[16].mxu0 %vm742_vm9, %v1325_v54 }
 0x3e7   : > { %3896 = vmatpush3.bf16.msra.mxu0 %v4260_v53  ;;  %3897 = vmatprep.mubr.msk.bf16.mxu0 %vm4523_vm6, %v4522_v25 }
 0x3e8   : > { %3907 = vmatprep.subr.bf16.mxu0 %v4522_v25 }
 0x3e9   : > { %v1427_v56 = vpop.f32.mrb[32].mxu1 }
 0x3ea   : > { %v3893_v57 = vpop.f32.mrb[33].mxu1 }
 0x3eb   : > { %v1430_v58 = vpop.f32.mrb[34].mxu1 }
 0x3ec   : > { %v1434_v60 = vpack.c.bf16 %v1430_v58, %v1427_v56  ;;  %v3894_v61 = vpop.f32.mrb[35].mxu1 }
 0x3ee   : > { %3898 = vmatmul.mubr.msk.bf16.vlgmr.msra.gmra.mrb[20].mxu0 %vm742_vm9, %v1434_v60 }
 0x3ef   : > { %3909 = vmatprep.mubr.msk.bf16.mxu0 %vm4523_vm6, %v4522_v25 }
 0x4a1   : > { %v1047_v63 = vpop.f32.mrb[4].mxu0 }
 0x4a2   : > { %v1054_v0 = vadd.f32 %v1047_v63, %v941_v23  ;;  %v3851_v1 = vpop.f32.mrb[5].mxu0 }
 0x4a3   : > { %v1050_v2 = vpop.f32.mrb[6].mxu0 }
 0x4a4   : > { %v1055_v4 = vadd.f32 %v1050_v2, %v944_v28  ;;  %v3852_v5 = vpop.f32.mrb[7].mxu0  ;;  %v1502_v28 = vmul.u32 2, %v4861_v26  ;;  %v4265_v2 = vld [vmem:[#allocation5 + $0x20] sm:$0xff]  }
 0x4a6   : > { %v1503_v32 = vadd.s32 4294967295, %v1502_v28  ;;  %vm1556_vm8 = vcmp.eq.s32.totalorder %v4850_v20, %v1502_v28  ;;  %v1720_v52 = vadd.s32 1, %v1502_v28 }
 0x4a7   : > { %v3574_v26 = vsel %vm1556_vm8, 1.0, %v4522_v25 }
 0x4a8   : > { %vm1504_vm7 = vcmp.eq.s32.totalorder %v4850_v20, %v1503_v32  ;;  %v5022_v47 = vpack.c.bf16 %v3574_v26, %v3574_v26  ;;  %vm1721_vm11 = vcmp.eq.s32.totalorder %v4850_v20, %v1720_v52  ;;  %v2160_v52 = vpack.c.bf16 %v4930_v62, %v4930_v62 }
 0x4a9   : > { %v1154_v6 = vpop.f32.mrb[8].mxu0  ;;  %v3572_v44 = vsel %vm1504_vm7, 1.0, %v4522_v25  ;;  %v3582_v1 = vsel %vm1721_vm11, 1.0, %v4522_v25  ;;  %v2372_v62 = vpack.c.bf16 %v4958_v8, %v4958_v8  ;;  %v4271_v8 = vld [vmem:[%s5323_s6 + $0x20] sm:$0xff]  }
 0x4aa   : > { %v1161_v7 = vadd.f32 %v1154_v6, %v1054_v0  ;;  %v3863_v9 = vpop.f32.mrb[9].mxu0  ;;  %v5020_v46 = vpack.c.bf16 %v3572_v44, %v3572_v44  ;;  %v5047_v20 = vpack.c.bf16 %v3582_v1, %v3582_v1  ;;  %v4273_v1 = vld [vmem:[%s5323_s6 + $0x30] sm:$0xff]  }
 0x4ab   : > { %v1157_v10 = vpop.f32.mrb[10].mxu0 }
 0x4ac   : > { %v1162_v11 = vadd.f32 %v1157_v10, %v1055_v4  ;;  %v3864_v12 = vpop.f32.mrb[11].mxu0  ;;  %v4266_v4 = vld [vmem:[#allocation5 + $0x28] sm:$0xff]  }
 0x4b1   : > { %v1263_v14 = vpop.f32.mrb[12].mxu0 }
 0x4b2   : > { %v1270_v15 = vadd.f32 %v1263_v14, %v1161_v7  ;;  %v3875_v16 = vpop.f32.mrb[13].mxu0 }
 0x4b3   : > { %v1266_v17 = vpop.f32.mrb[14].mxu0 }
 0x4b4   : > { %v1271_v18 = vadd.f32 %v1266_v17, %v1162_v11  ;;  %v3876_v19 = vpop.f32.mrb[15].mxu0 }
 0x4b9   : > { %v1372_v21 = vpop.f32.mrb[16].mxu0 }
 0x4ba   : > { %v1379_v22 = vadd.f32 %v1372_v21, %v1270_v15  ;;  %v3887_v24 = vpop.f32.mrb[17].mxu0 }
 0x4bb   : > { %v1375_v23 = vpop.f32.mrb[18].mxu0  ;;  %v3587_v24 = vld [vmem:[#allocation7] ss:$0 sm:$0xff] }
 0x4bc   : > { %v1380_v27 = vadd.f32 %v1375_v23, %v1271_v18  ;;  %v3888_v29 = vpop.f32.mrb[19].mxu0 }
 0x4c1   : > { %v1481_v30 = vpop.f32.mrb[20].mxu0 }
 0x4c2   : > { %v1488_v33 = vadd.f32 %v1481_v30, %v1379_v22  ;;  %v3899_v34 = vpop.f32.mrb[21].mxu0 }
 0x4c3   : > { %v1484_v35 = vpop.f32.mrb[22].mxu0 }
 0x4c4   : > { %v1497_v37 = vadd.f32 %v3571_v31, %v1488_v33  ;;  %v1489_v38 = vadd.f32 %v1484_v35, %v1380_v27  ;;  %v3900_v39 = vpop.f32.mrb[23].mxu0  ;;  %v1840_v33 = vpack.c.bf16 %v4871_v36, %v4871_v36  ;;  %v1894_v35 = vpack.c.bf16 %v4888_v42, %v4888_v42  ;;  %v4269_v36 = vld [vmem:[%s5323_s6 + $0x18] sm:$0xff]   ;;  %v4270_v42 = vld [vmem:[%s5323_s6 + $0x8] sm:$0xff]  }
 0x4c6   : > { %v1498_v40 = vadd.f32 %v3571_v31, %v1489_v38  ;;  %v1499_v41 = vmax.f32 %v1497_v37, 0.0  ;;  %v4267_v37 = vld [vmem:[%s5323_s6 + $0x10] sm:$0xff]   ;;  %v4268_v38 = vld [vmem:[%s5323_s6] sm:$0xff]  }
 0x4c8   : > { %v1500_v43 = vmax.f32 %v1498_v40, 0.0 }
 0x4ca   : > { %v1501_v45 = vpack.c.bf16 %v1500_v43, %v1499_v41 }
 0x4cc   : > { %3902 = vmatpush3.bf16.msra.mxu1 %v1501_v45  ;;  %3908 = vmatpush3.bf16.msra.mxu0 %v1501_v45 }
 0x4cd   : > { %3913 = vmatprep.subr.bf16.mxu1 %v4522_v25  ;;  %3921 = vmatprep.subr.bf16.mxu0 %v4522_v25 }
 0x4cf   : > { %3904 = vmatmul.mubr.msk.bf16.vlgmr.msra.gmra.mrb[36].mxu1 %vm742_vm9, %v5020_v46  ;;  %3910 = vmatmul.mubr.msk.bf16.vlgmr.msra.gmra.mrb[24].mxu0 %vm742_vm9, %v5022_v47 }
 0x4d0   : > { %3914 = vmatpush3.bf16.msra.mxu1 %v4261_v48  ;;  %3922 = vmatpush3.bf16.msra.mxu0 %v4262_v49 }
 0x4d1   : > { %3915 = vmatprep.subr.bf16.mxu1 %v4522_v25  ;;  %3923 = vmatprep.subr.bf16.mxu0 %v4522_v25 }
 0x4d2   : > { %3917 = vmatprep.mubr.msk.bf16.mxu1 %vm4523_vm6, %v4522_v25  ;;  %3925 = vmatprep.mubr.msk.bf16.mxu0 %vm4523_vm6, %v4522_v25 }
 0x4d4   : > { %3916 = vmatpush3.bf16.msra.mxu1 %v4263_v50  ;;  %3924 = vmatpush3.bf16.msra.mxu0 %v4264_v51  ;;  %v2054_v51 = vpack.c.bf16 %v4916_v59, %v4916_v59  ;;  %v2266_v59 = vpack.c.bf16 %v4944_v3, %v4944_v3  ;;  %v2478_v3 = vpack.c.bf16 %v4972_v13, %v4972_v13 }
 0x4d5   : > { %3929 = vmatprep.subr.bf16.mxu1 %v4522_v25  ;;  %3935 = vmatprep.subr.bf16.mxu0 %v4522_v25 }
 0x5a2   : > { %v1545_v53 = vpop.f32.mrb[36].mxu1  ;;  %v1597_v54 = vpop.f32.mrb[24].mxu0 }
 0x5a3   : > { %v1551_v55 = vpack.c.bf16 %v1545_v53, %v1545_v53  ;;  %v1603_v56 = vpack.c.bf16 %v1597_v54, %v1597_v54  ;;  %v3911_v57 = vpop.f32.mrb[25].mxu0  ;;  %v3905_v58 = vpop.f32.mrb[37].mxu1  ;;  %v4272_v53 = vld [vmem:[%s5323_s6 + $0x28] sm:$0xff]  }
 0x5a4   : > { %v1600_v60 = vpop.f32.mrb[26].mxu0  ;;  %v1548_v61 = vpop.f32.mrb[38].mxu1 }
 0x5a5   : > { %v3912_v63 = vpop.f32.mrb[27].mxu0  ;;  %3918 = vmatmul.mubr.msk.bf16.vlgmr.msra.gmra.mrb[40].mxu1 %vm1621_vm10, %v1603_v56  ;;  %3926 = vmatmul.mubr.msk.bf16.vlgmr.msra.gmra.mrb[28].mxu0 %vm1621_vm10, %v1551_v55  ;;  %v3906_v0 = vpop.f32.mrb[39].mxu1 }
 0x5a6   : > { %3930 = vmatpush3.bf16.msra.mxu1 %v1501_v45  ;;  %3931 = vmatprep.mubr.msk.bf16.mxu1 %vm4523_vm6, %v4522_v25 }
 0x5a7   : > { %3939 = vmatprep.mubr.msk.bf16.mxu0 %vm4523_vm6, %v4522_v25  ;;  %3943 = vmatprep.subr.bf16.mxu1 %v4522_v25 }
 0x5a8   : > { %3936 = vmatpush3.bf16.msra.mxu0 %v4265_v2 }
 0x5a9   : > { %3937 = vmatprep.subr.bf16.mxu0 %v4522_v25 }
 0x5ac   : > { %3938 = vmatpush3.bf16.msra.mxu0 %v4266_v4 }
 0x5ad   : > { %3932 = vmatmul.mubr.msk.bf16.vlgmr.msra.gmra.mrb[44].mxu1 %vm742_vm9, %v5047_v20  ;;  %3949 = vmatprep.subr.bf16.mxu0 %v4522_v25  ;;  %vm1845_vm9 = vcmask 1043456  }
 0x5ae   : > { %3945 = vmatprep.mubr.msk.bf16.mxu1 %vm4523_vm6, %v4522_v25 }
 0x678   : > { %v1659_v5 = vpop.f32.mrb[40].mxu1  ;;  %v1714_v6 = vpop.f32.mrb[28].mxu0 }
 0x679   : > { %v1715_v7 = vadd.f32 %v1714_v6, %v1659_v5  ;;  %v3919_v9 = vpop.f32.mrb[41].mxu1  ;;  %v3927_v10 = vpop.f32.mrb[29].mxu0 }
 0x67a   : > { %v1662_v11 = vpop.f32.mrb[42].mxu1  ;;  %v1717_v12 = vpop.f32.mrb[30].mxu0  ;;  %v4275_v10 = vld [vmem:[%s5323_s6 + $0x40] sm:$0xff]  }
 0x67b   : > { %v3920_v14 = vpop.f32.mrb[43].mxu1  ;;  %v3928_v15 = vpop.f32.mrb[31].mxu0 }
 0x680   : > { %v1762_v16 = vpop.f32.mrb[44].mxu1 }
 0x681   : > { %v1768_v17 = vpack.c.bf16 %v1762_v16, %v1762_v16  ;;  %v3933_v18 = vpop.f32.mrb[45].mxu1  ;;  %v4276_v16 = vld [vmem:[%s5323_s6 + $0x48] sm:$0xff]  }
 0x682   : > { %v1765_v19 = vpop.f32.mrb[46].mxu1  ;;  %v4277_v18 = vld [vmem:[%s5323_s6 + $0x50] sm:$0xff]  }
 0x683   : > { %v3934_v21 = vpop.f32.mrb[47].mxu1  ;;  %3940 = vmatmul.mubr.msk.bf16.vlgmr.msra.gmra.mrb[32].mxu0 %vm1621_vm10, %v1768_v17 }
 0x684   : > { %3951 = vmatprep.mubr.msk.bf16.mxu0 %vm4523_vm6, %v4522_v25 }
 0x756   : > { %v1823_v22 = vpop.f32.mrb[32].mxu0 }
 0x757   : > { %v1829_v23 = vadd.f32 %v1823_v22, %v1715_v7  ;;  %v3941_v27 = vpop.f32.mrb[33].mxu0  ;;  %v4274_v7 = vld [vmem:[%s5323_s6 + $0x38] sm:$0xff]  }
 0x758   : > { %v1826_v29 = vpop.f32.mrb[34].mxu0 }
 0x759   : > { %v1837_v28 = vadd.f32 %v3587_v24, %v1829_v23  ;;  %v3942_v30 = vpop.f32.mrb[35].mxu0  ;;  %v4278_v23 = vld [vmem:[%s5323_s6 + $0x58] sm:$0xff]   ;;  %v4279_v29 = vld [vmem:[%s5323_s6 + $0x60] sm:$0xff]  }
 0x75b   : > { %v1838_v31 = vmax.f32 %v1837_v28, 0.0 }
 0x75d   : > { %v1839_v32 = vpack.c.bf16 %v1838_v31, %v1838_v31 }
 0x75f   : > { %v1847_v34 = vsel %vm1845_vm9, %v1839_v32, 0 }
 0x760   : > { %3944 = vmatpush3.bf16.msra.mxu1 %v1847_v34  ;;  %3950 = vmatpush3.bf16.msra.mxu0 %v1847_v34 }
 0x761   : > { %3955 = vmatprep.subr.bf16.mxu1 %v4522_v25  ;;  %3963 = vmatprep.subr.bf16.mxu0 %v4522_v25 }
 0x763   : > { %3946 = vmatmul.mubr.msk.bf16.vlgmr.msra.gmra.mrb[48].mxu1 %vm1841_vm12, %v1840_v33  ;;  %3952 = vmatmul.mubr.msk.bf16.vlgmr.msra.gmra.mrb[36].mxu0 %vm1841_vm12, %v1894_v35  ;;  %v4280_v33 = vld [vmem:[%s5323_s6 + $0x68] sm:$0xff]  }
 0x764   : > { %3956 = vmatpush3.bf16.msra.mxu1 %v4267_v37  ;;  %3964 = vmatpush3.bf16.msra.mxu0 %v4268_v38 }
 0x765   : > { %3957 = vmatprep.subr.bf16.mxu1 %v4522_v25  ;;  %3965 = vmatprep.subr.bf16.mxu0 %v4522_v25 }
 0x766   : > { %3959 = vmatprep.mubr.msk.bf16.mxu1 %vm4523_vm6, %v4522_v25  ;;  %3967 = vmatprep.mubr.msk.bf16.mxu0 %vm4523_vm6, %v4522_v25 }
 0x768   : > { %3958 = vmatpush3.bf16.msra.mxu1 %v4269_v36  ;;  %3966 = vmatpush3.bf16.msra.mxu0 %v4270_v42 }
 0x769   : > { %3971 = vmatprep.subr.bf16.mxu1 %v4522_v25  ;;  %3977 = vmatprep.subr.bf16.mxu0 %v4522_v25 }
 0x836   : > { %v1883_v39 = vpop.f32.mrb[48].mxu1  ;;  %v1932_v40 = vpop.f32.mrb[36].mxu0 }
 0x837   : > { %v1889_v41 = vpack.c.bf16 %v1883_v39, %v1883_v39  ;;  %v1938_v43 = vpack.c.bf16 %v1932_v40, %v1932_v40  ;;  %v3953_v44 = vpop.f32.mrb[37].mxu0  ;;  %v3947_v26 = vpop.f32.mrb[49].mxu1 }
 0x838   : > { %v1935_v45 = vpop.f32.mrb[38].mxu0  ;;  %v1886_v48 = vpop.f32.mrb[50].mxu1 }
 0x839   : > { %v3954_v49 = vpop.f32.mrb[39].mxu0  ;;  %3960 = vmatmul.mubr.msk.bf16.vlgmr.msra.gmra.mrb[52].mxu1 %vm1621_vm10, %v1938_v43  ;;  %3968 = vmatmul.mubr.msk.bf16.vlgmr.msra.gmra.mrb[40].mxu0 %vm1621_vm10, %v1889_v41  ;;  %v3948_v50 = vpop.f32.mrb[51].mxu1 }
 0x83a   : > { %3972 = vmatpush3.bf16.msra.mxu1 %v1847_v34  ;;  %3973 = vmatprep.mubr.msk.bf16.mxu1 %vm4523_vm6, %v4522_v25 }
 0x83b   : > { %3985 = vmatprep.subr.bf16.mxu1 %v4522_v25  ;;  %3981 = vmatprep.mubr.msk.bf16.mxu0 %vm4523_vm6, %v4522_v25 }
 0x83c   : > { %3978 = vmatpush3.bf16.msra.mxu0 %v4271_v8 }
 0x83d   : > { %3979 = vmatprep.subr.bf16.mxu0 %v4522_v25 }
 0x840   : > { %3980 = vmatpush3.bf16.msra.mxu0 %v4272_v53 }
 0x841   : > { %3974 = vmatmul.mubr.msk.bf16.vlgmr.msra.gmra.mrb[56].mxu1 %vm1841_vm12, %v2054_v51  ;;  %3991 = vmatprep.subr.bf16.mxu0 %v4522_v25 }
 0x842   : > { %3986 = vmatpush3.bf16.msra.mxu1 %v1847_v34  ;;  %3987 = vmatprep.mubr.msk.bf16.mxu1 %vm4523_vm6, %v4522_v25 }
 0x843   : > { %3999 = vmatprep.subr.bf16.mxu1 %v4522_v25 }
 0x849   : > { %3988 = vmatmul.mubr.msk.bf16.vlgmr.msra.gmra.mrb[60].mxu1 %vm1841_vm12, %v2160_v52 }
 0x84a   : > { %4000 = vmatpush3.bf16.msra.mxu1 %v1847_v34  ;;  %4001 = vmatprep.mubr.msk.bf16.mxu1 %vm4523_vm6, %v4522_v25 }
 0x84b   : > { %4013 = vmatprep.subr.bf16.mxu1 %v4522_v25 }
 0x851   : > { %4002 = vmatmul.mubr.msk.bf16.vlgmr.msra.gmra.mrb[64].mxu1 %vm1841_vm12, %v2266_v59 }
 0x852   : > { %4014 = vmatpush3.bf16.msra.mxu1 %v1847_v34  ;;  %4015 = vmatprep.mubr.msk.bf16.mxu1 %vm4523_vm6, %v4522_v25 }
 0x853   : > { %4027 = vmatprep.subr.bf16.mxu1 %v4522_v25 }
 0x859   : > { %4016 = vmatmul.mubr.msk.bf16.vlgmr.msra.gmra.mrb[68].mxu1 %vm1841_vm12, %v2372_v62 }
 0x85a   : > { %4028 = vmatpush3.bf16.msra.mxu1 %v1847_v34  ;;  %4029 = vmatprep.mubr.msk.bf16.mxu1 %vm4523_vm6, %v4522_v25 }
 0x85b   : > { %4041 = vmatprep.subr.bf16.mxu1 %v4522_v25 }
 0x861   : > { %4030 = vmatmul.mubr.msk.bf16.vlgmr.msra.gmra.mrb[72].mxu1 %vm1841_vm12, %v2478_v3 }
 0x862   : > { %4043 = vmatprep.mubr.msk.bf16.mxu1 %vm4523_vm6, %v4522_v25 }
 0x90c   : > { %v1993_v13 = vpop.f32.mrb[52].mxu1  ;;  %v2048_v54 = vpop.f32.mrb[40].mxu0 }
 0x90d   : > { %v5131_v55 = vadd.f32 %v2048_v54, %v1993_v13  ;;  %v3961_v56 = vpop.f32.mrb[53].mxu1  ;;  %v3969_v57 = vpop.f32.mrb[41].mxu0 }
 0x90e   : > { %v1996_v58 = vpop.f32.mrb[54].mxu1  ;;  %v2051_v60 = vpop.f32.mrb[42].mxu0 }
 0x90f   : > { %v3962_v61 = vpop.f32.mrb[55].mxu1  ;;  %v3970_v63 = vpop.f32.mrb[43].mxu0 }
 0x914   : > { %v2092_v0 = vpop.f32.mrb[56].mxu1 }
 0x915   : > { %v2098_v2 = vpack.c.bf16 %v2092_v0, %v2092_v0  ;;  %v3975_v4 = vpop.f32.mrb[57].mxu1 }
 0x916   : > { %v2095_v5 = vpop.f32.mrb[58].mxu1  ;;  %v4281_v4 = vld [vmem:[#allocation8 + $0x10] sm:$0xff]  }
 0x917   : > { %v3976_v6 = vpop.f32.mrb[59].mxu1  ;;  %3982 = vmatmul.mubr.msk.bf16.vlgmr.msra.gmra.mrb[44].mxu0 %vm1621_vm10, %v2098_v2  ;;  %v4282_v5 = vld [vmem:[#allocation8] sm:$0xff]  }
 0x918   : > { %3992 = vmatpush3.bf16.msra.mxu0 %v4273_v1  ;;  %3995 = vmatprep.mubr.msk.bf16.mxu0 %vm4523_vm6, %v4522_v25  ;;  %v4283_v6 = vld [vmem:[#allocation8 + $0x18] sm:$0xff]  }
 0x919   : > { %3993 = vmatprep.subr.bf16.mxu0 %v4522_v25 }
 0x91c   : > { %v2198_v9 = vpop.f32.mrb[60].mxu1  ;;  %3994 = vmatpush3.bf16.msra.mxu0 %v4274_v7  ;;  %v4284_v7 = vld [vmem:[#allocation8 + $0x8] sm:$0xff]  }
 0x91d   : > { %v2204_v11 = vpack.c.bf16 %v2198_v9, %v2198_v9  ;;  %v3989_v12 = vpop.f32.mrb[61].mxu1  ;;  %4005 = vmatprep.subr.bf16.mxu0 %v4522_v25 }
 0x91e   : > { %v2201_v14 = vpop.f32.mrb[62].mxu1 }
 0x91f   : > { %v3990_v15 = vpop.f32.mrb[63].mxu1  ;;  %3996 = vmatmul.mubr.msk.bf16.vlgmr.msra.gmra.mrb[48].mxu0 %vm1621_vm10, %v2204_v11 }
 0x920   : > { %4006 = vmatpush3.bf16.msra.mxu0 %v4275_v10  ;;  %4009 = vmatprep.mubr.msk.bf16.mxu0 %vm4523_vm6, %v4522_v25 }
 0x921   : > { %4007 = vmatprep.subr.bf16.mxu0 %v4522_v25 }
 0x924   : > { %v2304_v17 = vpop.f32.mrb[64].mxu1  ;;  %4008 = vmatpush3.bf16.msra.mxu0 %v4276_v16 }
 0x925   : > { %v2310_v19 = vpack.c.bf16 %v2304_v17, %v2304_v17  ;;  %v4003_v21 = vpop.f32.mrb[65].mxu1  ;;  %4019 = vmatprep.subr.bf16.mxu0 %v4522_v25 }
 0x926   : > { %v2307_v22 = vpop.f32.mrb[66].mxu1  ;;  %v4285_v21 = vld [vmem:[#allocation8 + $0x20] sm:$0xff]  }
 0x927   : > { %v4004_v24 = vpop.f32.mrb[67].mxu1  ;;  %4010 = vmatmul.mubr.msk.bf16.vlgmr.msra.gmra.mrb[52].mxu0 %vm1621_vm10, %v2310_v19  ;;  %v4286_v22 = vld [vmem:[#allocation8 + $0x28] sm:$0xff]  }
 0x928   : > { %4020 = vmatpush3.bf16.msra.mxu0 %v4277_v18  ;;  %4023 = vmatprep.mubr.msk.bf16.mxu0 %vm4523_vm6, %v4522_v25 }
 0x929   : > { %4021 = vmatprep.subr.bf16.mxu0 %v4522_v25 }
 0x92c   : > { %v2410_v27 = vpop.f32.mrb[68].mxu1  ;;  %4022 = vmatpush3.bf16.msra.mxu0 %v4278_v23 }
 0x92d   : > { %v2416_v28 = vpack.c.bf16 %v2410_v27, %v2410_v27  ;;  %v4017_v30 = vpop.f32.mrb[69].mxu1  ;;  %4033 = vmatprep.subr.bf16.mxu0 %v4522_v25 }
 0x92e   : > { %v2413_v31 = vpop.f32.mrb[70].mxu1 }
 0x92f   : > { %v4018_v32 = vpop.f32.mrb[71].mxu1  ;;  %4024 = vmatmul.mubr.msk.bf16.vlgmr.msra.gmra.mrb[56].mxu0 %vm1621_vm10, %v2416_v28 }
 0x930   : > { %4034 = vmatpush3.bf16.msra.mxu0 %v4279_v29  ;;  %4037 = vmatprep.mubr.msk.bf16.mxu0 %vm4523_vm6, %v4522_v25 }
 0x931   : > { %4035 = vmatprep.subr.bf16.mxu0 %v4522_v25 }
 0x934   : > { %v2516_v34 = vpop.f32.mrb[72].mxu1  ;;  %4036 = vmatpush3.bf16.msra.mxu0 %v4280_v33 }
 0x935   : > { %v2522_v35 = vpack.c.bf16 %v2516_v34, %v2516_v34  ;;  %v4031_v37 = vpop.f32.mrb[73].mxu1  ;;  %4047 = vmatprep.subr.bf16.mxu0 %v4522_v25 }
 0x936   : > { %v2519_v38 = vpop.f32.mrb[74].mxu1 }
 0x937   : > { %v4032_v36 = vpop.f32.mrb[75].mxu1  ;;  %4038 = vmatmul.mubr.msk.bf16.vlgmr.msra.gmra.mrb[60].mxu0 %vm1621_vm10, %v2522_v35 }
 0x938   : > { %4049 = vmatprep.mubr.msk.bf16.mxu0 %vm4523_vm6, %v4522_v25 }
 0x9ea   : > { %v2153_v42 = vpop.f32.mrb[44].mxu0 }
 0x9eb   : > { %v2159_v39 = vadd.f32 %v2153_v42, %v5131_v55  ;;  %v3983_v40 = vpop.f32.mrb[45].mxu0  ;;  %v3640_v55 = vld [vmem:[%s5324_s7] ss:$0 sm:$0xff] }
 0x9ec   : > { %v2156_v41 = vpop.f32.mrb[46].mxu0 }
 0x9ed   : > { %v3984_v43 = vpop.f32.mrb[47].mxu0 }
 0x9f2   : > { %v2259_v44 = vpop.f32.mrb[48].mxu0 }
 0x9f3   : > { %v2265_v26 = vadd.f32 %v2259_v44, %v2159_v39  ;;  %v3997_v45 = vpop.f32.mrb[49].mxu0  ;;  %v3653_v39 = vld [vmem:[%s5326_s9] ss:$0 sm:$0xff] }
 0x9f4   : > { %v2262_v48 = vpop.f32.mrb[50].mxu0 }
 0x9f5   : > { %v3998_v49 = vpop.f32.mrb[51].mxu0 }
 0x9fa   : > { %v2365_v50 = vpop.f32.mrb[52].mxu0 }
 0x9fb   : > { %v2371_v51 = vadd.f32 %v2365_v50, %v2265_v26  ;;  %v4011_v52 = vpop.f32.mrb[53].mxu0  ;;  %v4287_v50 = vld [vmem:[#allocation10 + $0x10] sm:$0xff]  }
 0x9fc   : > { %v2368_v59 = vpop.f32.mrb[54].mxu0  ;;  %v4289_v52 = vld [vmem:[#allocation10] sm:$0xff]  }
 0x9fd   : > { %v4012_v62 = vpop.f32.mrb[55].mxu0 }
 0xa02   : > { %v2471_v3 = vpop.f32.mrb[56].mxu0 }
 0xa03   : > { %v2477_v8 = vadd.f32 %v2471_v3, %v2371_v51  ;;  %v4025_v53 = vpop.f32.mrb[57].mxu0  ;;  %v4288_v51 = vld [vmem:[#allocation10 + $0x18] sm:$0xff]  }
 0xa04   : > { %v2474_v13 = vpop.f32.mrb[58].mxu0 }
 0xa05   : > { %v4026_v54 = vpop.f32.mrb[59].mxu0 }
 0xa0a   : > { %v2577_v56 = vpop.f32.mrb[60].mxu0 }
 0xa0b   : > { %v2583_v57 = vadd.f32 %v2577_v56, %v2477_v8  ;;  %v4039_v58 = vpop.f32.mrb[61].mxu0 }
 0xa0c   : > { %v2580_v60 = vpop.f32.mrb[62].mxu0  ;;  %v4292_v58 = vld [vmem:[#allocation10 + $0x28] sm:$0xff]  }
 0xa0d   : > { %v2591_v61 = vadd.f32 %v3640_v55, %v2583_v57  ;;  %v4040_v63 = vpop.f32.mrb[63].mxu0  ;;  %v4291_v57 = vld [vmem:[#allocation10 + $0x20] sm:$0xff]  }
 0xa0f   : > { %v2592_v0 = vmax.f32 %v2591_v61, 0.0 }
 0xa11   : > { %v2593_v1 = vpack.c.bf16 %v2592_v0, %v2592_v0 }
 0xa13   : > { %v2597_v2 = vsel %vm1845_vm9, %v2593_v1, 0 }
 0xa14   : > { %4042 = vmatpush3.bf16.msra.mxu1 %v2597_v2  ;;  %4048 = vmatpush3.bf16.msra.mxu0 %v2597_v2 }
 0xa15   : > { %4053 = vmatprep.subr.bf16.mxu1 %v4522_v25  ;;  %4061 = vmatprep.subr.bf16.mxu0 %v4522_v25 }
 0xa17   : > { %4044 = vmatmul.mubr.msk.bf16.vlgmr.msra.gmra.mrb[76].mxu1 %vm1841_vm12, %v5020_v46  ;;  %4050 = vmatmul.mubr.msk.bf16.vlgmr.msra.gmra.mrb[64].mxu0 %vm1841_vm12, %v5022_v47 }
 0xa18   : > { %4054 = vmatpush3.bf16.msra.mxu1 %v4281_v4  ;;  %4062 = vmatpush3.bf16.msra.mxu0 %v4282_v5 }
 0xa19   : > { %4055 = vmatprep.subr.bf16.mxu1 %v4522_v25  ;;  %4063 = vmatprep.subr.bf16.mxu0 %v4522_v25 }
 0xa1a   : > { %4057 = vmatprep.mubr.msk.bf16.mxu1 %vm4523_vm6, %v4522_v25  ;;  %4065 = vmatprep.mubr.msk.bf16.mxu0 %vm4523_vm6, %v4522_v25 }
 0xa1c   : > { %4056 = vmatpush3.bf16.msra.mxu1 %v4283_v6  ;;  %4064 = vmatpush3.bf16.msra.mxu0 %v4284_v7 }
 0xa1d   : > { %4069 = vmatprep.subr.bf16.mxu1 %v4522_v25  ;;  %4075 = vmatprep.subr.bf16.mxu0 %v4522_v25 }
 0xaea   : > { %v2633_v9 = vpop.f32.mrb[76].mxu1  ;;  %v2680_v10 = vpop.f32.mrb[64].mxu0 }
 0xaeb   : > { %v2639_v11 = vpack.c.bf16 %v2633_v9, %v2633_v9  ;;  %v2686_v12 = vpack.c.bf16 %v2680_v10, %v2680_v10  ;;  %v4051_v14 = vpop.f32.mrb[65].mxu0  ;;  %v4045_v15 = vpop.f32.mrb[77].mxu1 }
 0xaec   : > { %v2683_v16 = vpop.f32.mrb[66].mxu0  ;;  %v2636_v17 = vpop.f32.mrb[78].mxu1  ;;  %v4294_v14 = vld [vmem:[%s5329_s12 + $0x10] sm:$0xff]   ;;  %v4295_v15 = vld [vmem:[%s5329_s12 + $0x8] sm:$0xff]  }
 0xaed   : > { %v4052_v18 = vpop.f32.mrb[67].mxu0  ;;  %4058 = vmatmul.mubr.msk.bf16.vlgmr.msra.gmra.mrb[80].mxu1 %vm1621_vm10, %v2686_v12  ;;  %4066 = vmatmul.mubr.msk.bf16.vlgmr.msra.gmra.mrb[68].mxu0 %vm1621_vm10, %v2639_v11  ;;  %v4046_v19 = vpop.f32.mrb[79].mxu1  ;;  %v4293_v12 = vld [vmem:[%s5329_s12] sm:$0xff]   ;;  %v4296_v16 = vld [vmem:[%s5329_s12 + $0x18] sm:$0xff]  }
 0xaee   : > { %4070 = vmatpush3.bf16.msra.mxu1 %v2597_v2  ;;  %4071 = vmatprep.mubr.msk.bf16.mxu1 %vm4523_vm6, %v4522_v25  ;;  %v3666_v18 = vld [vmem:[%s5368_s21] ss:$0 sm:$0xff] }
 0xaef   : > { %4079 = vmatprep.mubr.msk.bf16.mxu0 %vm4523_vm6, %v4522_v25  ;;  %4083 = vmatprep.subr.bf16.mxu1 %v4522_v25 }
 0xaf0   : > { %4076 = vmatpush3.bf16.msra.mxu0 %v4285_v21 }
 0xaf1   : > { %4077 = vmatprep.subr.bf16.mxu0 %v4522_v25 }
 0xaf4   : > { %4078 = vmatpush3.bf16.msra.mxu0 %v4286_v22 }
 0xaf5   : > { %4072 = vmatmul.mubr.msk.bf16.vlgmr.msra.gmra.mrb[84].mxu1 %vm1841_vm12, %v5047_v20  ;;  %4089 = vmatprep.subr.bf16.mxu0 %v4522_v25 }
 0xaf6   : > { %4085 = vmatprep.mubr.msk.bf16.mxu1 %vm4523_vm6, %v4522_v25 }
 0xbc0   : > { %v2741_v24 = vpop.f32.mrb[80].mxu1  ;;  %v2796_v23 = vpop.f32.mrb[68].mxu0 }
 0xbc1   : > { %v2797_v27 = vadd.f32 %v2796_v23, %v2741_v24  ;;  %v4059_v29 = vpop.f32.mrb[81].mxu1  ;;  %v4067_v28 = vpop.f32.mrb[69].mxu0 }
 0xbc2   : > { %v2744_v30 = vpop.f32.mrb[82].mxu1  ;;  %v2799_v31 = vpop.f32.mrb[70].mxu0 }
 0xbc3   : > { %v4060_v32 = vpop.f32.mrb[83].mxu1  ;;  %v4068_v33 = vpop.f32.mrb[71].mxu0 }
 0xbc4   : > { %v3361_v32 = vld [vmem:[%s5369_s11] sm:$0x1] }
 0xbc8   : > { %v2838_v34 = vpop.f32.mrb[84].mxu1 }
 0xbc9   : > { %v2844_v35 = vpack.c.bf16 %v2838_v34, %v2838_v34  ;;  %v4073_v37 = vpop.f32.mrb[85].mxu1 }
 0xbca   : > { %v2841_v38 = vpop.f32.mrb[86].mxu1 }
 0xbcb   : > { %v4074_v36 = vpop.f32.mrb[87].mxu1  ;;  %4080 = vmatmul.mubr.msk.bf16.vlgmr.msra.gmra.mrb[72].mxu0 %vm1621_vm10, %v2844_v35 }
 0xbcc   : > { %4091 = vmatprep.mubr.msk.bf16.mxu0 %vm4523_vm6, %v4522_v25 }
 0xc9e   : > { %v2899_v42 = vpop.f32.mrb[72].mxu0 }
 0xc9f   : > { %v2905_v40 = vadd.f32 %v2899_v42, %v2797_v27  ;;  %v4081_v41 = vpop.f32.mrb[73].mxu0 }
 0xca0   : > { %v2902_v43 = vpop.f32.mrb[74].mxu0 }
 0xca1   : > { %v2913_v44 = vadd.f32 %v3653_v39, %v2905_v40  ;;  %v4082_v26 = vpop.f32.mrb[75].mxu0 }
 0xca3   : > { %v2914_v45 = vmax.f32 %v2913_v44, 0.0 }
 0xca5   : > { %v2915_v48 = vpack.c.bf16 %v2914_v45, %v2914_v45 }
 0xca7   : > { %v2921_v49 = vsel %vm2919_vm13, %v2915_v48, 0 }
 0xca8   : > { %4084 = vmatpush3.bf16.msra.mxu1 %v2921_v49  ;;  %4090 = vmatpush3.bf16.msra.mxu0 %v2921_v49 }
 0xca9   : > { %4095 = vmatprep.subr.bf16.mxu1 %v4522_v25  ;;  %4103 = vmatprep.subr.bf16.mxu0 %v4522_v25 }
 0xcab   : > { %4092 = vmatmul.mubr.msk.bf16.vlgmr.msra.gmra.mrb[76].mxu0 %vm2916_vm14, %v5022_v47  ;;  %4086 = vmatmul.mubr.msk.bf16.vlgmr.msra.gmra.mrb[88].mxu1 %vm2916_vm14, %v5020_v46  ;;  %v4290_v47 = vld [vmem:[#allocation10 + $0x8] sm:$0xff]  }
 0xcac   : > { %4096 = vmatpush3.bf16.msra.mxu1 %v4287_v50  ;;  %4099 = vmatprep.mubr.msk.bf16.mxu1 %vm4523_vm6, %v4522_v25 }
 0xcad   : > { %4097 = vmatprep.subr.bf16.mxu1 %v4522_v25  ;;  %4107 = vmatprep.mubr.msk.bf16.mxu0 %vm4523_vm6, %v4522_v25 }
 0xcae   : > { %4104 = vmatpush3.bf16.msra.mxu0 %v4289_v52 }
 0xcaf   : > { %4105 = vmatprep.subr.bf16.mxu0 %v4522_v25 }
 0xcb0   : > { %4098 = vmatpush3.bf16.msra.mxu1 %v4288_v51 }
 0xcb1   : > { %4111 = vmatprep.subr.bf16.mxu1 %v4522_v25 }
 0xcb2   : > { %4106 = vmatpush3.bf16.msra.mxu0 %v4290_v47 }
 0xcb3   : > { %4117 = vmatprep.subr.bf16.mxu0 %v4522_v25 }
 0xd7e   : > { %v3004_v46 = vpop.f32.mrb[76].mxu0  ;;  %v2957_v59 = vpop.f32.mrb[88].mxu1 }
 0xd7f   : > { %v3010_v62 = vpack.c.bf16 %v3004_v46, %v3004_v46  ;;  %v4093_v3 = vpop.f32.mrb[77].mxu0  ;;  %v2963_v8 = vpack.c.bf16 %v2957_v59, %v2957_v59  ;;  %v4087_v53 = vpop.f32.mrb[89].mxu1 }
 0xd80   : > { %v3007_v13 = vpop.f32.mrb[78].mxu0  ;;  %v2960_v54 = vpop.f32.mrb[90].mxu1 }
 0xd81   : > { %4100 = vmatmul.mubr.msk.bf16.vlgmr.msra.gmra.mrb[92].mxu1 %vm1621_vm10, %v3010_v62  ;;  %v4094_v56 = vpop.f32.mrb[79].mxu0  ;;  %4108 = vmatmul.mubr.msk.bf16.vlgmr.msra.gmra.mrb[80].mxu0 %vm1621_vm10, %v2963_v8  ;;  %v4088_v55 = vpop.f32.mrb[91].mxu1 }
 0xd82   : > { %4112 = vmatpush3.bf16.msra.mxu1 %v2921_v49  ;;  %4113 = vmatprep.mubr.msk.bf16.mxu1 %vm4523_vm6, %v4522_v25 }
 0xd83   : > { %4121 = vmatprep.mubr.msk.bf16.mxu0 %vm4523_vm6, %v4522_v25  ;;  %4125 = vmatprep.subr.bf16.mxu1 %v4522_v25 }
 0xd84   : > { %4118 = vmatpush3.bf16.msra.mxu0 %v4291_v57 }
 0xd85   : > { %4119 = vmatprep.subr.bf16.mxu0 %v4522_v25 }
 0xd88   : > { %4120 = vmatpush3.bf16.msra.mxu0 %v4292_v58 }
 0xd89   : > { %4114 = vmatmul.mubr.msk.bf16.vlgmr.msra.gmra.mrb[96].mxu1 %vm2916_vm14, %v5047_v20  ;;  %4133 = vmatprep.subr.bf16.mxu0 %v4522_v25 }
 0xd8a   : > { %4129 = vmatprep.mubr.msk.bf16.mxu1 %vm4523_vm6, %v4522_v25  ;;  %4126 = vmatpush3.bf16.msra.mxu1 %v4294_v14 }
 0xd8b   : > { %4127 = vmatprep.subr.bf16.mxu1 %v4522_v25 }
 0xd8e   : > { %4128 = vmatpush3.bf16.msra.mxu1 %v4296_v16 }
 0xe54   : > { %v3065_v60 = vpop.f32.mrb[92].mxu1  ;;  %v3120_v61 = vpop.f32.mrb[80].mxu0 }
 0xe55   : > { %v4101_v63 = vpop.f32.mrb[93].mxu1  ;;  %v3121_v0 = vadd.f32 %v3120_v61, %v3065_v60  ;;  %v4109_v1 = vpop.f32.mrb[81].mxu0 }
 0xe56   : > { %v3068_v2 = vpop.f32.mrb[94].mxu1  ;;  %v3123_v4 = vpop.f32.mrb[82].mxu0 }
 0xe57   : > { %v4102_v5 = vpop.f32.mrb[95].mxu1  ;;  %v4110_v20 = vpop.f32.mrb[83].mxu0 }
 0xe5c   : > { %v3162_v6 = vpop.f32.mrb[96].mxu1 }
 0xe5d   : > { %v3168_v7 = vpack.c.bf16 %v3162_v6, %v3162_v6  ;;  %v4115_v9 = vpop.f32.mrb[97].mxu1 }
 0xe5e   : > { %v3165_v10 = vpop.f32.mrb[98].mxu1 }
 0xe5f   : > { %4122 = vmatmul.mubr.msk.bf16.vlgmr.msra.gmra.mrb[84].mxu0 %vm1621_vm10, %v3168_v7  ;;  %v4116_v11 = vpop.f32.mrb[99].mxu1 }
 0xe60   : > { %4137 = vmatprep.mubr.msk.bf16.mxu0 %vm4523_vm6, %v4522_v25  ;;  %4134 = vmatpush3.bf16.msra.mxu0 %v4293_v12  ;;  %vm3364_vm6 = vcmask 253952  }
 0xe61   : > { %4135 = vmatprep.subr.bf16.mxu0 %v4522_v25 }
 0xe64   : > { %4136 = vmatpush3.bf16.msra.mxu0 %v4295_v15 }
 0xf32   : > { %v3223_v17 = vpop.f32.mrb[84].mxu0 }
 0xf33   : > { %v3229_v19 = vadd.f32 %v3223_v17, %v3121_v0  ;;  %v4123_v21 = vpop.f32.mrb[85].mxu0 }
 0xf34   : > { %v3226_v22 = vpop.f32.mrb[86].mxu0 }
 0xf35   : > { %v3237_v24 = vadd.f32 %v3666_v18, %v3229_v19  ;;  %v4124_v23 = vpop.f32.mrb[87].mxu0 }
 0xf37   : > { %v3238_v27 = vmax.f32 %v3237_v24, 0.0 }
 0xf39   : > { %v3239_v25 = vpack.c.bf16 %v3238_v27, %v3238_v27 }
 0xf3b   : > { %v3250_v29 = vshrl.u32 %v3239_v25, 16  ;;  %4138 = vmatmul.mubr.msk.bf16.vlgmr.msra.gmra.mrb[88].mxu0 %vm1621_vm10, %v3239_v25 }
 0xf3d   : > { %4130 = vmatmul.mubr.msk.bf16.vlgmr.msra.gmra.mrb[100].mxu1 %vm1621_vm10, %v3250_v29 }
0x100e   : > { %v3355_v28 = vpop.f32.mrb[88].mxu0 }
0x100f   : > { %v4139_v30 = vpop.f32.mrb[89].mxu0 }
0x1010   : > { %v3301_v31 = vpop.f32.mrb[100].mxu1  ;;  %v3358_v33 = vpop.f32.mrb[90].mxu0 }
0x1011   : > { %v3356_v34 = vadd.f32 %v3355_v28, %v3301_v31  ;;  %v4131_v35 = vpop.f32.mrb[101].mxu1  ;;  %v4140_v37 = vpop.f32.mrb[91].mxu0 }
0x1012   : > { %v3304_v38 = vpop.f32.mrb[102].mxu1 }
0x1013   : > { %v3362_v36 = vadd.f32 %v3361_v32, %v3356_v34  ;;  %v4132_v42 = vpop.f32.mrb[103].mxu1 }
0x1015   : > { %v3363_v39 = vmax.f32 %v3362_v36, 0.0 }
0x1017   : > { %3365 = vst.msk [vmem:[%s528_s13] sm:$0x1] %vm3364_vm6, %v3363_v39 }
0x1018   : > { %4450 = shalt.err (!%p4447_p0)
}
0x1019   : > { %s4451_s21 = scalar_lea.hbm %s5275_s19, 16  ;;  %s4455_s20 = scalar_lea.hbm %s5371_s28, 32 }
0x101a   : > { %p4452_p10 = scmp.ne.s32.totalorder %s5275_s19, %s4451_s21  ;;  %p4456_p4 = scmp.lt.u32.totalorder %s5275_s19, %s5371_s28 }
0x101b   : > { %p4457_p12 = scmp.lt.u32.totalorder %s4455_s20, %s4451_s21  ;;  %p4459_p8 = scmp.lt.u32.totalorder %s4451_s21, %s5275_s19 }
0x101c   : > { %p4453_p2 = pnand %p4452_p10, %p5372_p11 }
0x101d   : > { %p4458_p7 = por %p4457_p12, %p4456_p4 }
0x101e   : > { %p4454_p3 = pneg %p4453_p2 }
0x101f   : > { %p4460_p13 = por %p4459_p8, %p4458_p7 }
0x1021   : > { %p4461_p1 = pnand %p4460_p13, %p4454_p3 }
0x1023   : > { %4464 = shalt.err (!%p4461_p1)
}
0x1024   : > { %4161 = dma.vmem_to_hbm [thread:$0]  (%p5372_p11), %s5277_s14, 16, %s5275_s19, %s3367_s26  }
0x1025 PF: > { %s5373_s13 = sld [smem:[#allocation18_spill]]  ;;  %s5374_s16 = sld [smem:[#allocation16_spill]] }
0x1026   : > { %s5375_s25 = sld [smem:[#allocation22_spill]] }
0x102b   : > { %p4193_p6 = scmp.ge.s32.totalorder %s5373_s13, 2  ;;  %s3391_s24 = sand.u32 1, %s5374_s16  }
0x102c   : > { %p5376_p9 = scmp.ne.s32.totalorder %s5375_s25, 0  ;;  %s3392_s17 = scalar_lea.sflag [#allocation4], %s3391_s24 }
0x102e   : > { %p4180_p5 = pnand %p4193_p6, %p5376_p9 }
0x1030   : > { %4494 = dma.done.wait (!%p4180_p5), %s3392_s17, 16  }
0x1031   : > { %4496 = vsyncadd (!%p4180_p5), %s3392_s17, 4294967280  ;;  %s5377_s16 = sld [smem:[#allocation19_spill]]  ;;  %s5378_s15 = sld [smem:[#allocation17_spill]] }
0x1032   : > { %s5379_s18 = sld [smem:[#allocation20_spill]]  ;;  %s5380_s29 = smov %s4503_s30 }
0x1037   : > { %p27_p0 = scmp.ge.s32.totalorder %s5377_s16, 4   ;;  %s5381_s30 = smov %s5378_s15 }
0x1038   : > { %s5382_s15 = smov %s5379_s18 }
0x1039   :  { %29 = sbr.rel (!%p27_p0) target bundleno = 10 (0xa), region = 151 }
0x1040   :  { %3396 = vsyncpa [#allocation3], 1 }
0x1041   :  { %3398 = vsyncpa [#allocation3 + $0x1], 1 }
0x1042   :  { %3399 = vsyncpa [#allocation6], 1 }
0x1043   :  { %3400 = vsyncpa [#allocation9], 1 }
0x1044   :  { %3401 = vsyncpa [#allocation4], 1 }
0x1045   :  { %3403 = vsyncpa [#allocation4 + $0x1], 1 }

</bundles_post_ra>
